<compile_context>
chip_gen: v5e
topology: v5e:2x2
jax: 0.10.0
libtpu: 0.0.40
codegen_flags: <defaults>
</compile_context>

<pallas_src>
import jax
import jax.numpy as jnp
from jax.experimental import pallas as pl
from jax.experimental.pallas import tpu as pltpu

LN_EPS = 1e-5


def _round_up(x, m):
    return ((x + m - 1) // m) * m


def _pad2(a, rows, cols):
    r, c = a.shape
    if r == rows and c == cols:
        return a
    return jnp.pad(a, ((0, rows - r), (0, cols - c)))


def prepare_low_dim_weights(params, *, compute_dtype=jnp.bfloat16):
    """Host-side weight prep (transpose / fuse / pad / cast). Call ONCE, reuse across calls."""
    f32 = jnp.float32
    cdt = compute_dtype

    I = params["bp1_w"].shape[1]            # input_dim   (bp1_w: (I//4, I))
    O = params["bp2_w"].shape[0]            # output_dim  (bp2_w: (O, I//4))
    H = params["ftall_w"].shape[1] - O      # hidden_dim  (ftall_w: (O, H+O))
    Hff = params["ffn_w1"].shape[0]         # d_ff * output_dim

    # --- Compose the two Basic_Position linears (no nonlinearity between them) ---
    #   bp = (x @ W1^T + b1) @ W2^T + b2 = x @ (W1^T W2^T) + (b1 @ W2^T + b2)
    w_bp1t = params["bp1_w"].T.astype(f32)                      # (I,  I4)
    w_bp2t = params["bp2_w"].T.astype(f32)                      # (I4, O)
    w_bp = w_bp1t @ w_bp2t                                      # (I,  O)
    b_bp = params["bp1_b"].astype(f32) @ w_bp2t + params["bp2_b"].astype(f32)   # (O,)

    # --- FT1 || FT2 fused along the output axis; cat(sem, x) split into sem/x parts ---
    wt_ft1 = params["ft1_w"].T.astype(f32)                      # (H+O, O//2)
    wt_ft2 = params["ft2_w"].T.astype(f32)                      # (H+O, O//2)
    w_ft12_s = jnp.concatenate([wt_ft1[:H], wt_ft2[:H]], axis=1)    # (H, O)
    w_ft12_p = jnp.concatenate([wt_ft1[H:], wt_ft2[H:]], axis=1)    # (O, O)
    b_ft12 = jnp.concatenate([params["ft1_b"], params["ft2_b"]]).astype(f32)    # (O,)

    wt_fta = params["ftall_w"].T.astype(f32)                    # (H+O, O)
    w_fta_s, w_fta_p = wt_fta[:H], wt_fta[H:]                   # (H, O), (O, O)
    b_fta = params["ftall_b"].astype(f32)                       # (O,)

    w1 = params["ffn_w1"].T.astype(f32)                         # (O,  Hff)
    w2 = params["ffn_w2"].T.astype(f32)                         # (Hff, O)

    # --- lane-dense padding: every feature axis -> multiple of 128 ---
    Hp, Ip, Op, Hffp = (_round_up(d, 128) for d in (H, I, O, Hff))

    # Fuse the two sem-side matmuls into a single (Hp, 2*Op) weight: columns [0, Op) are the
    # padded [FT1;FT2] sem-part, columns [Op, 2*Op) are the padded FTALL sem-part.
    w_sem_p = jnp.concatenate(
        [_pad2(w_ft12_s, Hp, Op), _pad2(w_fta_s, Hp, Op)], axis=1).astype(cdt)     # (Hp, 2*Op)
    b_sem_p = jnp.concatenate(
        [jnp.pad(b_ft12, (0, Op - O)), jnp.pad(b_fta, (0, Op - O))]).reshape(1, 2 * Op)  # f32

    return dict(
        H=H, I=I, O=O, Hff=Hff, Hp=Hp, Ip=Ip, Op=Op, Hffp=Hffp,
        compute_dtype=cdt,
        w_bp=_pad2(w_bp, Ip, Op).astype(cdt),
        b_bp=jnp.pad(b_bp, (0, Op - O)).reshape(1, Op),            # f32 (added to f32 accum)
        w_sem=w_sem_p,
        b_sem=b_sem_p,
        w_ft12_p=_pad2(w_ft12_p, Op, Op).astype(cdt),
        w_fta_p=_pad2(w_fta_p, Op, Op).astype(cdt),
        w1=_pad2(w1, Op, Hffp).astype(cdt),
        w2=_pad2(w2, Hffp, Op).astype(cdt),
    )


def low_dim_generate(sem, origin, params=None, *, prepared=None, row_tile=256,
                     compute_dtype=jnp.bfloat16, out_dtype=None, ln_eps=LN_EPS):
    """sem: (..., H), origin: (..., I) -> (..., O). `params` holds PyTorch-layout weights,
    or pass `prepared=prepare_low_dim_weights(params, ...)` (preferred, prepares once)."""
    if prepared is None:
        assert params is not None, "pass either params or prepared"
        prepared = prepare_low_dim_weights(params, compute_dtype=compute_dtype)
    p = prepared
    cdt = p["compute_dtype"]
    H, I, O, Hff = p["H"], p["I"], p["O"], p["Hff"]
    Hp, Ip, Op, Hffp = p["Hp"], p["Ip"], p["Op"], p["Hffp"]

    *lead, Hs = sem.shape
    *lead2, Is = origin.shape
    assert Hs == H and Is == I and tuple(lead) == tuple(lead2), "shape mismatch vs weights"

    if out_dtype is None:
        out_dtype = sem.dtype

    N = 1
    for d in lead:
        N *= int(d)

    # Row tile: large (sweep 512/1024 on v5e when weights are small), multiple of 8,
    # but capped so there are >= 2 grid steps when possible (v7x dual-TC megacore).
    tm = min(int(row_tile), -(-N // 2))
    tm = max(8, _round_up(tm, 8))
    grid_rows = -(-N // tm)          # ragged last block allowed: output writes are masked

    # Cast FIRST (halves the pad intermediate), lane-pad only if needed, no row padding.
    sem2 = sem.reshape(N, H).astype(cdt)
    org2 = origin.reshape(N, I).astype(cdt)
    if Hp != H:
        sem2 = jnp.pad(sem2, ((0, 0), (0, Hp - H)))
    if Ip != I:
        org2 = jnp.pad(org2, ((0, 0), (0, Ip - I)))

    inv_out = 1.0 / float(O)

    def kernel(sem_ref, org_ref, wbp, bbp, wsem, bsem, wf12p, wfap, w1r, w2r, o_ref):
        sem_t = sem_ref[...]                     # (tm, Hp)  compute dtype
        org_t = org_ref[...]                     # (tm, Ip)  compute dtype

        # Basic_Position collapsed into a single biased matmul (composed on the host).
        bp = jnp.dot(org_t, wbp[...], preferred_element_type=jnp.float32) + bbp[...]

        # One 2*Op-wide sem matmul covering both the [FT1;FT2] and FTALL sem-parts.
        sem_out = jnp.dot(sem_t, wsem[...], preferred_element_type=jnp.float32) + bsem[...]

        ft12 = sem_out[:, :Op] + jnp.dot(bp.astype(cdt), wf12p[...],
                                         preferred_element_type=jnp.float32)
        ftpos = bp + ft12

        ftall = sem_out[:, Op:] + jnp.dot(ftpos.astype(cdt), wfap[...],
                                          preferred_element_type=jnp.float32)
        ftpos = ftpos + ftall

        # PoswiseFeedForwardNet: relu(x W1) W2 + x, then LayerNorm (gamma=1, beta=0).
        h = jnp.maximum(jnp.dot(ftpos.astype(cdt), w1r[...],
                                preferred_element_type=jnp.float32), 0.0)
        y = jnp.dot(h.astype(cdt), w2r[...], preferred_element_type=jnp.float32)
        z = y + ftpos                            # padded lanes are exactly 0 by construction

        # Two-pass LayerNorm statistics over the TRUE feature count O (mask padded lanes).
        mean = jnp.sum(z, axis=-1, keepdims=True) * inv_out
        zc = z - mean
        if O != Op:
            lane = jax.lax.broadcasted_iota(jnp.int32, (1, Op), 1)
            zc = jnp.where(lane < O, zc, 0.0)
        var = jnp.sum(zc * zc, axis=-1, keepdims=True) * inv_out
        o_ref[...] = (zc * jax.lax.rsqrt(var + ln_eps)).astype(o_ref.dtype)

    cdt_bytes = jnp.dtype(cdt).itemsize
    out_bytes = jnp.dtype(out_dtype).itemsize
    w_mats = (p["w_bp"], p["w_sem"], p["w_ft12_p"], p["w_fta_p"], p["w1"], p["w2"])
    biases = (p["b_bp"], p["b_sem"])
    weight_bytes = sum(int(a.size) * a.dtype.itemsize for a in w_mats)
    bias_bytes = sum(int(a.size) * a.dtype.itemsize for a in biases)

    # Advisory cost estimate with the true (un-padded) arithmetic.
    flops = int(2 * N * (I * O + 2 * H * O + 2 * O * O + 2 * O * Hff))
    bytes_accessed = int(N * (Hp + Ip) * cdt_bytes + N * Op * out_bytes
                         + weight_bytes + bias_bytes)
    cost = pl.CostEstimate(flops=flops, transcendentals=N, bytes_accessed=bytes_accessed)

    row = lambda w: pl.BlockSpec((tm, w), lambda i: (i, 0))

    def build(single_buffer_weights):
        wbuf = 1 if single_buffer_weights else 2
        # Explicit VMEM budget: resident weights + double-buffered activation tiles + a rough
        # bound on the f32 intermediates; clamped to 64 MiB so it is legal on v7x too.
        est = (wbuf * (weight_bytes + bias_bytes)
               + 2 * tm * (Hp + Ip) * cdt_bytes
               + 2 * tm * Op * out_bytes
               + tm * (6 * Op + Hffp) * 4)
        vmem_limit = min(max(int(est * 1.4) + (2 << 20), 8 << 20), 64 << 20)

        def const(r, c):
            if single_buffer_weights:
                # Constant index_map -> resident weights; single-buffer them to save VMEM.
                return pl.BlockSpec((r, c), lambda i: (0, 0), pipeline_mode=pl.Buffered(1))
            return pl.BlockSpec((r, c), lambda i: (0, 0))

        return pl.pallas_call(
            kernel,
            out_shape=jax.ShapeDtypeStruct((N, Op), out_dtype),
            grid_spec=pltpu.PrefetchScalarGridSpec(
                num_scalar_prefetch=0,
                grid=(grid_rows,),
                in_specs=[
                    row(Hp),                 # sem rows
                    row(Ip),                 # origin rows
                    const(Ip, Op),           # composed Basic_Position weight
                    const(1, Op),            # composed Basic_Position bias
                    const(Hp, 2 * Op),       # fused sem-part weight ([FT1;FT2] | FTALL)
                    const(1, 2 * Op),        # fused sem-part bias
                    const(Op, Op),           # [FT1;FT2] position-part
                    const(Op, Op),           # FTALL position-part
                    const(Op, Hffp),         # FFN W1
                    const(Hffp, Op),         # FFN W2
                ],
                out_specs=pl.BlockSpec((tm, Op), lambda i: (i, 0)),
            ),
            compiler_params=pltpu.CompilerParams(
                dimension_semantics=("parallel",),
                vmem_limit_bytes=vmem_limit,
            ),
            cost_estimate=cost,
        )

    args = (sem2, org2, p["w_bp"], p["b_bp"], p["w_sem"], p["b_sem"],
            p["w_ft12_p"], p["w_fta_p"], p["w1"], p["w2"])

    try:
        out = build(single_buffer_weights=True)(*args)
    except Exception:
        # Fallback for jax builds that reject pipeline_mode=pl.Buffered(1) on a top-level
        # pallas_call spec: identical kernel, default (double) buffering of the weights.
        out = build(single_buffer_weights=False)(*args)

    return out[:, :O].reshape(*lead, O)


# ---------------- pure-JAX reference (mirrors the PyTorch forward exactly) ----------------
def reference_forward(sem, origin, params, *, ln_eps=LN_EPS):
    def linear(x, w, b=None):
        y = x @ w.T
        return y + b if b is not None else y

    bp = linear(linear(origin, params["bp1_w"], params["bp1_b"]),
                params["bp2_w"], params["bp2_b"])
    cat1 = jnp.concatenate([sem, bp], axis=-1)
    ft1 = linear(cat1, params["ft1_w"], params["ft1_b"])
    ft2 = linear(cat1, params["ft2_w"], params["ft2_b"])
    ftpos = bp + jnp.concatenate([ft1, ft2], axis=-1)
    ftall = linear(jnp.concatenate([sem, ftpos], axis=-1),
                   params["ftall_w"], params["ftall_b"])
    ftpos = ftpos + ftall
    h = jnp.maximum(linear(ftpos, params["ffn_w1"]), 0.0)
    y = linear(h, params["ffn_w2"])
    z = y + ftpos
    mean = jnp.mean(z, axis=-1, keepdims=True)
    var = jnp.mean((z - mean) ** 2, axis=-1, keepdims=True)
    return (z - mean) / jnp.sqrt(var + ln_eps)


if __name__ == "__main__":
    # Small shapes consistent with the module.
    B, S = 2, 8
    hidden_dim, input_dim, output_dim, d_ff = 32, 32, 32, 1
    I4, O2, Hff = input_dim // 4, output_dim // 2, d_ff * output_dim

    key = jax.random.PRNGKey(0)
    keys = jax.random.split(key, 14)

    def w(k, shape, scale=0.1):
        return jax.random.normal(k, shape, dtype=jnp.float32) * scale

    # PyTorch Linear layout: weight is (out, in).
    params = {
        "bp1_w": w(keys[0], (I4, input_dim)), "bp1_b": w(keys[1], (I4,)),
        "bp2_w": w(keys[2], (output_dim, I4)), "bp2_b": w(keys[3], (output_dim,)),
        "ft1_w": w(keys[4], (O2, hidden_dim + output_dim)), "ft1_b": w(keys[5], (O2,)),
        "ft2_w": w(keys[6], (O2, hidden_dim + output_dim)), "ft2_b": w(keys[7], (O2,)),
        "ftall_w": w(keys[8], (output_dim, hidden_dim + output_dim)),
        "ftall_b": w(keys[9], (output_dim,)),
        "ffn_w1": w(keys[10], (Hff, output_dim)),
        "ffn_w2": w(keys[11], (output_dim, Hff)),
    }

    sem = jax.random.normal(keys[12], (B, S, hidden_dim), dtype=jnp.float32)
    origin = jax.random.normal(keys[13], (B, S, input_dim), dtype=jnp.float32)

    ref = reference_forward(sem, origin, params)

    # f32 MXU-operand path with weights prepared ONCE and reused: tight check.
    prep_f32 = prepare_low_dim_weights(params, compute_dtype=jnp.float32)
    out_f32 = jax.block_until_ready(low_dim_generate(sem, origin, prepared=prep_f32))
    assert out_f32.shape == (B, S, output_dim)
    assert jnp.allclose(out_f32, ref, atol=1e-3, rtol=1e-3), "f32 path mismatch vs reference"

    # Ragged-N path (N=5 is not a multiple of the row tile): verifies masked output writes.
    sem_r, org_r = sem[:1, :5], origin[:1, :5]
    ref_r = reference_forward(sem_r, org_r, params)
    out_r = jax.block_until_ready(low_dim_generate(sem_r, org_r, prepared=prep_f32))
    assert out_r.shape == (1, 5, output_dim)
    assert jnp.allclose(out_r, ref_r, atol=1e-3, rtol=1e-3), "ragged-N path mismatch"

    # Default bf16-operand / f32-accumulate path (v6e/v7x fast path): looser check.
    out_bf16 = jax.block_until_ready(low_dim_generate(sem, origin, params))
    assert out_bf16.shape == (B, S, output_dim)
    assert float(jnp.max(jnp.abs(out_bf16.astype(jnp.float32) - ref))) < 0.15, \
        "bf16 path mismatch vs reference"

    print("KERNEL_OK")
</pallas_src>

<mosaic_0001>
module attributes {stable_mosaic.version = 11 : i64} {
  func.func @kernel(%arg0: i32, %arg1: memref<8x128xf32, #tpu.memory_space<vmem>>, %arg2: memref<8x128xf32, #tpu.memory_space<vmem>>, %arg3: memref<128x128xf32, #tpu.memory_space<vmem>>, %arg4: memref<1x128xf32, #tpu.memory_space<vmem>>, %arg5: memref<128x256xf32, #tpu.memory_space<vmem>>, %arg6: memref<1x256xf32, #tpu.memory_space<vmem>>, %arg7: memref<128x128xf32, #tpu.memory_space<vmem>>, %arg8: memref<128x128xf32, #tpu.memory_space<vmem>>, %arg9: memref<128x128xf32, #tpu.memory_space<vmem>>, %arg10: memref<128x128xf32, #tpu.memory_space<vmem>>, %arg11: memref<8x128xf32, #tpu.memory_space<vmem>>) attributes {dimension_semantics = [#tpu.dimension_semantics<parallel>], iteration_bounds = array<i64: 2>, scalar_prefetch = 0 : i64, scratch_operands = 0 : i64, tpu.core_type = #tpu.core_type<tc>, window_params = [{transform_indices = @transform_0, window_bounds = array<i64: 8, 128>}, {transform_indices = @transform_1, window_bounds = array<i64: 8, 128>}, {pipeline_mode = #tpu.pipeline_mode<synchronous>, transform_indices = @transform_2, window_bounds = array<i64: 128, 128>}, {pipeline_mode = #tpu.pipeline_mode<synchronous>, transform_indices = @transform_3, window_bounds = array<i64: 1, 128>}, {pipeline_mode = #tpu.pipeline_mode<synchronous>, transform_indices = @transform_4, window_bounds = array<i64: 128, 256>}, {pipeline_mode = #tpu.pipeline_mode<synchronous>, transform_indices = @transform_5, window_bounds = array<i64: 1, 256>}, {pipeline_mode = #tpu.pipeline_mode<synchronous>, transform_indices = @transform_6, window_bounds = array<i64: 128, 128>}, {pipeline_mode = #tpu.pipeline_mode<synchronous>, transform_indices = @transform_7, window_bounds = array<i64: 128, 128>}, {pipeline_mode = #tpu.pipeline_mode<synchronous>, transform_indices = @transform_8, window_bounds = array<i64: 128, 128>}, {pipeline_mode = #tpu.pipeline_mode<synchronous>, transform_indices = @transform_9, window_bounds = array<i64: 128, 128>}, {transform_indices = @transform_10, window_bounds = array<i64: 8, 128>}]} {
    %c0 = arith.constant 0 : index
    %c0_0 = arith.constant 0 : index
    %0 = vector.load %arg1[%c0, %c0_0] : memref<8x128xf32, #tpu.memory_space<vmem>>, vector<8x128xf32>
    %c0_1 = arith.constant 0 : index
    %c0_2 = arith.constant 0 : index
    %1 = vector.load %arg2[%c0_1, %c0_2] : memref<8x128xf32, #tpu.memory_space<vmem>>, vector<8x128xf32>
    %c0_3 = arith.constant 0 : index
    %c0_4 = arith.constant 0 : index
    %2 = vector.load %arg3[%c0_3, %c0_4] : memref<128x128xf32, #tpu.memory_space<vmem>>, vector<128x128xf32>
    %cst = arith.constant dense<0.000000e+00> : vector<8x128xf32>
    %3 = tpu.matmul %1, %2, %cst {dimension_numbers = #tpu.dot_dimension_numbers<[1], [0], [0], [1], [0, 0, 1, 1], [], []>} : vector<8x128xf32>, vector<128x128xf32>, vector<8x128xf32> -> vector<8x128xf32>
    %c0_5 = arith.constant 0 : index
    %c0_6 = arith.constant 0 : index
    %4 = vector.load %arg4[%c0_5, %c0_6] : memref<1x128xf32, #tpu.memory_space<vmem>>, vector<1x128xf32>
    %5 = vector.broadcast %4 : vector<1x128xf32> to vector<8x128xf32>
    %6 = arith.addf %3, %5 : vector<8x128xf32>
    %c0_7 = arith.constant 0 : index
    %c0_8 = arith.constant 0 : index
    %7 = vector.load %arg5[%c0_7, %c0_8] : memref<128x256xf32, #tpu.memory_space<vmem>>, vector<128x256xf32>
    %cst_9 = arith.constant dense<0.000000e+00> : vector<8x256xf32>
    %8 = tpu.matmul %0, %7, %cst_9 {dimension_numbers = #tpu.dot_dimension_numbers<[1], [0], [0], [1], [0, 0, 1, 1], [], []>} : vector<8x128xf32>, vector<128x256xf32>, vector<8x256xf32> -> vector<8x256xf32>
    %c0_10 = arith.constant 0 : index
    %c0_11 = arith.constant 0 : index
    %9 = vector.load %arg6[%c0_10, %c0_11] : memref<1x256xf32, #tpu.memory_space<vmem>>, vector<1x256xf32>
    %10 = vector.broadcast %9 : vector<1x256xf32> to vector<8x256xf32>
    %11 = arith.addf %8, %10 : vector<8x256xf32>
    %12 = vector.extract_strided_slice %11 {offsets = [0, 0], sizes = [8, 128], strides = [1, 1]} : vector<8x256xf32> to vector<8x128xf32>
    %c0_12 = arith.constant 0 : index
    %c0_13 = arith.constant 0 : index
    %13 = vector.load %arg7[%c0_12, %c0_13] : memref<128x128xf32, #tpu.memory_space<vmem>>, vector<128x128xf32>
    %cst_14 = arith.constant dense<0.000000e+00> : vector<8x128xf32>
    %14 = tpu.matmul %6, %13, %cst_14 {dimension_numbers = #tpu.dot_dimension_numbers<[1], [0], [0], [1], [0, 0, 1, 1], [], []>} : vector<8x128xf32>, vector<128x128xf32>, vector<8x128xf32> -> vector<8x128xf32>
    %15 = arith.addf %12, %14 : vector<8x128xf32>
    %16 = arith.addf %6, %15 : vector<8x128xf32>
    %17 = vector.extract_strided_slice %11 {offsets = [0, 128], sizes = [8, 128], strides = [1, 1]} : vector<8x256xf32> to vector<8x128xf32>
    %c0_15 = arith.constant 0 : index
    %c0_16 = arith.constant 0 : index
    %18 = vector.load %arg8[%c0_15, %c0_16] : memref<128x128xf32, #tpu.memory_space<vmem>>, vector<128x128xf32>
    %cst_17 = arith.constant dense<0.000000e+00> : vector<8x128xf32>
    %19 = tpu.matmul %16, %18, %cst_17 {dimension_numbers = #tpu.dot_dimension_numbers<[1], [0], [0], [1], [0, 0, 1, 1], [], []>} : vector<8x128xf32>, vector<128x128xf32>, vector<8x128xf32> -> vector<8x128xf32>
    %20 = arith.addf %17, %19 : vector<8x128xf32>
    %21 = arith.addf %16, %20 : vector<8x128xf32>
    %c0_18 = arith.constant 0 : index
    %c0_19 = arith.constant 0 : index
    %22 = vector.load %arg9[%c0_18, %c0_19] : memref<128x128xf32, #tpu.memory_space<vmem>>, vector<128x128xf32>
    %cst_20 = arith.constant dense<0.000000e+00> : vector<8x128xf32>
    %23 = tpu.matmul %21, %22, %cst_20 {dimension_numbers = #tpu.dot_dimension_numbers<[1], [0], [0], [1], [0, 0, 1, 1], [], []>} : vector<8x128xf32>, vector<128x128xf32>, vector<8x128xf32> -> vector<8x128xf32>
    %cst_21 = arith.constant 0.000000e+00 : f32
    %24 = vector.broadcast %cst_21 : f32 to vector<8x128xf32>
    %25 = arith.maximumf %23, %24 : vector<8x128xf32>
    %c0_22 = arith.constant 0 : index
    %c0_23 = arith.constant 0 : index
    %26 = vector.load %arg10[%c0_22, %c0_23] : memref<128x128xf32, #tpu.memory_space<vmem>>, vector<128x128xf32>
    %cst_24 = arith.constant dense<0.000000e+00> : vector<8x128xf32>
    %27 = tpu.matmul %25, %26, %cst_24 {dimension_numbers = #tpu.dot_dimension_numbers<[1], [0], [0], [1], [0, 0, 1, 1], [], []>} : vector<8x128xf32>, vector<128x128xf32>, vector<8x128xf32> -> vector<8x128xf32>
    %28 = arith.addf %27, %21 : vector<8x128xf32>
    %cst_25 = arith.constant dense<0.000000e+00> : vector<8xf32>
    %29 = vector.multi_reduction <add>, %28, %cst_25 [1] : vector<8x128xf32> to vector<8xf32>
    %30 = vector.shape_cast %29 : vector<8xf32> to vector<8x1xf32>
    %cst_26 = arith.constant 3.125000e-02 : f32
    %31 = vector.broadcast %cst_26 : f32 to vector<8x1xf32>
    %32 = arith.mulf %30, %31 : vector<8x1xf32>
    %33 = vector.broadcast %32 : vector<8x1xf32> to vector<8x128xf32>
    %34 = arith.subf %28, %33 : vector<8x128xf32>
    %35 = tpu.iota {dimensions = array<i32: 1>} : vector<1x128xi32>
    %c32_i32 = arith.constant 32 : i32
    %36 = vector.broadcast %c32_i32 : i32 to vector<1x128xi32>
    %37 = arith.cmpi slt, %35, %36 : vector<1x128xi32>
    %cst_27 = arith.constant 0.000000e+00 : f32
    %38 = vector.shape_cast %37 : vector<1x128xi1> to vector<1x128xi1>
    %39 = vector.broadcast %38 : vector<1x128xi1> to vector<8x128xi1>
    %40 = vector.broadcast %cst_27 : f32 to vector<8x128xf32>
    %41 = arith.select %39, %34, %40 : vector<8x128xi1>, vector<8x128xf32>
    %42 = arith.mulf %41, %41 : vector<8x128xf32>
    %cst_28 = arith.constant dense<0.000000e+00> : vector<8xf32>
    %43 = vector.multi_reduction <add>, %42, %cst_28 [1] : vector<8x128xf32> to vector<8xf32>
    %44 = vector.shape_cast %43 : vector<8xf32> to vector<8x1xf32>
    %cst_29 = arith.constant 3.125000e-02 : f32
    %45 = vector.broadcast %cst_29 : f32 to vector<8x1xf32>
    %46 = arith.mulf %44, %45 : vector<8x1xf32>
    %cst_30 = arith.constant 9.99999974E-6 : f32
    %47 = vector.broadcast %cst_30 : f32 to vector<8x1xf32>
    %48 = arith.addf %46, %47 : vector<8x1xf32>
    %49 = math.rsqrt %48 : vector<8x1xf32>
    %50 = vector.broadcast %49 : vector<8x1xf32> to vector<8x128xf32>
    %51 = arith.mulf %41, %50 : vector<8x128xf32>
    %c0_31 = arith.constant 0 : index
    %c0_32 = arith.constant 0 : index
    %52 = vector.load %arg11[%c0_31, %c0_32] : memref<8x128xf32, #tpu.memory_space<vmem>>, vector<8x128xf32>
    tpu.vector_store %arg11[%c0_31, %c0_32], %51 {strides = array<i32>} : memref<8x128xf32, #tpu.memory_space<vmem>>, vector<8x128xf32>,
    return
  }
  func.func @transform_0(%arg0: i32) -> (i32, i32) {
    %c0_i32 = arith.constant 0 : i32
    %c0_i32_0 = arith.constant 0 : i32
    return %arg0, %c0_i32 : i32, i32
  }
  func.func @transform_1(%arg0: i32) -> (i32, i32) {
    %c0_i32 = arith.constant 0 : i32
    %c0_i32_0 = arith.constant 0 : i32
    return %arg0, %c0_i32 : i32, i32
  }
  func.func @transform_2(%arg0: i32) -> (i32, i32) {
    %c0_i32 = arith.constant 0 : i32
    %c0_i32_0 = arith.constant 0 : i32
    %c0_i32_1 = arith.constant 0 : i32
    return %c0_i32, %c0_i32_0 : i32, i32
  }
  func.func @transform_3(%arg0: i32) -> (i32, i32) {
    %c0_i32 = arith.constant 0 : i32
    %c0_i32_0 = arith.constant 0 : i32
    %c0_i32_1 = arith.constant 0 : i32
    return %c0_i32, %c0_i32_0 : i32, i32
  }
  func.func @transform_4(%arg0: i32) -> (i32, i32) {
    %c0_i32 = arith.constant 0 : i32
    %c0_i32_0 = arith.constant 0 : i32
    %c0_i32_1 = arith.constant 0 : i32
    return %c0_i32, %c0_i32_0 : i32, i32
  }
  func.func @transform_5(%arg0: i32) -> (i32, i32) {
    %c0_i32 = arith.constant 0 : i32
    %c0_i32_0 = arith.constant 0 : i32
    %c0_i32_1 = arith.constant 0 : i32
    return %c0_i32, %c0_i32_0 : i32, i32
  }
  func.func @transform_6(%arg0: i32) -> (i32, i32) {
    %c0_i32 = arith.constant 0 : i32
    %c0_i32_0 = arith.constant 0 : i32
    %c0_i32_1 = arith.constant 0 : i32
    return %c0_i32, %c0_i32_0 : i32, i32
  }
  func.func @transform_7(%arg0: i32) -> (i32, i32) {
    %c0_i32 = arith.constant 0 : i32
    %c0_i32_0 = arith.constant 0 : i32
    %c0_i32_1 = arith.constant 0 : i32
    return %c0_i32, %c0_i32_0 : i32, i32
  }
  func.func @transform_8(%arg0: i32) -> (i32, i32) {
    %c0_i32 = arith.constant 0 : i32
    %c0_i32_0 = arith.constant 0 : i32
    %c0_i32_1 = arith.constant 0 : i32
    return %c0_i32, %c0_i32_0 : i32, i32
  }
  func.func @transform_9(%arg0: i32) -> (i32, i32) {
    %c0_i32 = arith.constant 0 : i32
    %c0_i32_0 = arith.constant 0 : i32
    %c0_i32_1 = arith.constant 0 : i32
    return %c0_i32, %c0_i32_0 : i32, i32
  }
  func.func @transform_10(%arg0: i32) -> (i32, i32) {
    %c0_i32 = arith.constant 0 : i32
    %c0_i32_0 = arith.constant 0 : i32
    return %arg0, %c0_i32 : i32, i32
  }
}

module attributes {stable_mosaic.version = 11 : i64} {
  func.func @kernel(%arg0: i32, %arg1: memref<8x128xf32, #tpu.memory_space<vmem>>, %arg2: memref<8x128xf32, #tpu.memory_space<vmem>>, %arg3: memref<128x128xf32, #tpu.memory_space<vmem>>, %arg4: memref<1x128xf32, #tpu.memory_space<vmem>>, %arg5: memref<128x256xf32, #tpu.memory_space<vmem>>, %arg6: memref<1x256xf32, #tpu.memory_space<vmem>>, %arg7: memref<128x128xf32, #tpu.memory_space<vmem>>, %arg8: memref<128x128xf32, #tpu.memory_space<vmem>>, %arg9: memref<128x128xf32, #tpu.memory_space<vmem>>, %arg10: memref<128x128xf32, #tpu.memory_space<vmem>>, %arg11: memref<8x128xf32, #tpu.memory_space<vmem>>) attributes {dimension_semantics = [#tpu.dimension_semantics<parallel>], iteration_bounds = array<i64: 2>, scalar_prefetch = 0 : i64, scratch_operands = 0 : i64, tpu.core_type = #tpu.core_type<tc>, window_params = [{transform_indices = @transform_0, window_bounds = array<i64: 8, 128>}, {transform_indices = @transform_1, window_bounds = array<i64: 8, 128>}, {pipeline_mode = #tpu.pipeline_mode<synchronous>, transform_indices = @transform_2, window_bounds = array<i64: 128, 128>}, {pipeline_mode = #tpu.pipeline_mode<synchronous>, transform_indices = @transform_3, window_bounds = array<i64: 1, 128>}, {pipeline_mode = #tpu.pipeline_mode<synchronous>, transform_indices = @transform_4, window_bounds = array<i64: 128, 256>}, {pipeline_mode = #tpu.pipeline_mode<synchronous>, transform_indices = @transform_5, window_bounds = array<i64: 1, 256>}, {pipeline_mode = #tpu.pipeline_mode<synchronous>, transform_indices = @transform_6, window_bounds = array<i64: 128, 128>}, {pipeline_mode = #tpu.pipeline_mode<synchronous>, transform_indices = @transform_7, window_bounds = array<i64: 128, 128>}, {pipeline_mode = #tpu.pipeline_mode<synchronous>, transform_indices = @transform_8, window_bounds = array<i64: 128, 128>}, {pipeline_mode = #tpu.pipeline_mode<synchronous>, transform_indices = @transform_9, window_bounds = array<i64: 128, 128>}, {transform_indices = @transform_10, window_bounds = array<i64: 8, 128>}]} {
    %c0 = arith.constant 0 : index
    %c0_0 = arith.constant 0 : index
    %0 = vector.load %arg1[%c0, %c0_0] : memref<8x128xf32, #tpu.memory_space<vmem>>, vector<8x128xf32>
    %c0_1 = arith.constant 0 : index
    %c0_2 = arith.constant 0 : index
    %1 = vector.load %arg2[%c0_1, %c0_2] : memref<8x128xf32, #tpu.memory_space<vmem>>, vector<8x128xf32>
    %c0_3 = arith.constant 0 : index
    %c0_4 = arith.constant 0 : index
    %2 = vector.load %arg3[%c0_3, %c0_4] : memref<128x128xf32, #tpu.memory_space<vmem>>, vector<128x128xf32>
    %cst = arith.constant dense<0.000000e+00> : vector<8x128xf32>
    %3 = tpu.matmul %1, %2, %cst {dimension_numbers = #tpu.dot_dimension_numbers<[1], [0], [0], [1], [0, 0, 1, 1], [], []>} : vector<8x128xf32>, vector<128x128xf32>, vector<8x128xf32> -> vector<8x128xf32>
    %c0_5 = arith.constant 0 : index
    %c0_6 = arith.constant 0 : index
    %4 = vector.load %arg4[%c0_5, %c0_6] : memref<1x128xf32, #tpu.memory_space<vmem>>, vector<1x128xf32>
    %5 = vector.broadcast %4 : vector<1x128xf32> to vector<8x128xf32>
    %6 = arith.addf %3, %5 : vector<8x128xf32>
    %c0_7 = arith.constant 0 : index
    %c0_8 = arith.constant 0 : index
    %7 = vector.load %arg5[%c0_7, %c0_8] : memref<128x256xf32, #tpu.memory_space<vmem>>, vector<128x256xf32>
    %cst_9 = arith.constant dense<0.000000e+00> : vector<8x256xf32>
    %8 = tpu.matmul %0, %7, %cst_9 {dimension_numbers = #tpu.dot_dimension_numbers<[1], [0], [0], [1], [0, 0, 1, 1], [], []>} : vector<8x128xf32>, vector<128x256xf32>, vector<8x256xf32> -> vector<8x256xf32>
    %c0_10 = arith.constant 0 : index
    %c0_11 = arith.constant 0 : index
    %9 = vector.load %arg6[%c0_10, %c0_11] : memref<1x256xf32, #tpu.memory_space<vmem>>, vector<1x256xf32>
    %10 = vector.broadcast %9 : vector<1x256xf32> to vector<8x256xf32>
    %11 = arith.addf %8, %10 : vector<8x256xf32>
    %12 = vector.extract_strided_slice %11 {offsets = [0, 0], sizes = [8, 128], strides = [1, 1]} : vector<8x256xf32> to vector<8x128xf32>
    %c0_12 = arith.constant 0 : index
    %c0_13 = arith.constant 0 : index
    %13 = vector.load %arg7[%c0_12, %c0_13] : memref<128x128xf32, #tpu.memory_space<vmem>>, vector<128x128xf32>
    %cst_14 = arith.constant dense<0.000000e+00> : vector<8x128xf32>
    %14 = tpu.matmul %6, %13, %cst_14 {dimension_numbers = #tpu.dot_dimension_numbers<[1], [0], [0], [1], [0, 0, 1, 1], [], []>} : vector<8x128xf32>, vector<128x128xf32>, vector<8x128xf32> -> vector<8x128xf32>
    %15 = arith.addf %12, %14 : vector<8x128xf32>
    %16 = arith.addf %6, %15 : vector<8x128xf32>
    %17 = vector.extract_strided_slice %11 {offsets = [0, 128], sizes = [8, 128], strides = [1, 1]} : vector<8x256xf32> to vector<8x128xf32>
    %c0_15 = arith.constant 0 : index
    %c0_16 = arith.constant 0 : index
    %18 = vector.load %arg8[%c0_15, %c0_16] : memref<128x128xf32, #tpu.memory_space<vmem>>, vector<128x128xf32>
    %cst_17 = arith.constant dense<0.000000e+00> : vector<8x128xf32>
    %19 = tpu.matmul %16, %18, %cst_17 {dimension_numbers = #tpu.dot_dimension_numbers<[1], [0], [0], [1], [0, 0, 1, 1], [], []>} : vector<8x128xf32>, vector<128x128xf32>, vector<8x128xf32> -> vector<8x128xf32>
    %20 = arith.addf %17, %19 : vector<8x128xf32>
    %21 = arith.addf %16, %20 : vector<8x128xf32>
    %c0_18 = arith.constant 0 : index
    %c0_19 = arith.constant 0 : index
    %22 = vector.load %arg9[%c0_18, %c0_19] : memref<128x128xf32, #tpu.memory_space<vmem>>, vector<128x128xf32>
    %cst_20 = arith.constant dense<0.000000e+00> : vector<8x128xf32>
    %23 = tpu.matmul %21, %22, %cst_20 {dimension_numbers = #tpu.dot_dimension_numbers<[1], [0], [0], [1], [0, 0, 1, 1], [], []>} : vector<8x128xf32>, vector<128x128xf32>, vector<8x128xf32> -> vector<8x128xf32>
    %cst_21 = arith.constant 0.000000e+00 : f32
    %24 = vector.broadcast %cst_21 : f32 to vector<8x128xf32>
    %25 = arith.maximumf %23, %24 : vector<8x128xf32>
    %c0_22 = arith.constant 0 : index
    %c0_23 = arith.constant 0 : index
    %26 = vector.load %arg10[%c0_22, %c0_23] : memref<128x128xf32, #tpu.memory_space<vmem>>, vector<128x128xf32>
    %cst_24 = arith.constant dense<0.000000e+00> : vector<8x128xf32>
    %27 = tpu.matmul %25, %26, %cst_24 {dimension_numbers = #tpu.dot_dimension_numbers<[1], [0], [0], [1], [0, 0, 1, 1], [], []>} : vector<8x128xf32>, vector<128x128xf32>, vector<8x128xf32> -> vector<8x128xf32>
    %28 = arith.addf %27, %21 : vector<8x128xf32>
    %cst_25 = arith.constant dense<0.000000e+00> : vector<8xf32>
    %29 = vector.multi_reduction <add>, %28, %cst_25 [1] : vector<8x128xf32> to vector<8xf32>
    %30 = vector.shape_cast %29 : vector<8xf32> to vector<8x1xf32>
    %cst_26 = arith.constant 3.125000e-02 : f32
    %31 = vector.broadcast %cst_26 : f32 to vector<8x1xf32>
    %32 = arith.mulf %30, %31 : vector<8x1xf32>
    %33 = vector.broadcast %32 : vector<8x1xf32> to vector<8x128xf32>
    %34 = arith.subf %28, %33 : vector<8x128xf32>
    %35 = tpu.iota {dimensions = array<i32: 1>} : vector<1x128xi32>
    %c32_i32 = arith.constant 32 : i32
    %36 = vector.broadcast %c32_i32 : i32 to vector<1x128xi32>
    %37 = arith.cmpi slt, %35, %36 : vector<1x128xi32>
    %cst_27 = arith.constant 0.000000e+00 : f32
    %38 = vector.shape_cast %37 : vector<1x128xi1> to vector<1x128xi1>
    %39 = vector.broadcast %38 : vector<1x128xi1> to vector<8x128xi1>
    %40 = vector.broadcast %cst_27 : f32 to vector<8x128xf32>
    %41 = arith.select %39, %34, %40 : vector<8x128xi1>, vector<8x128xf32>
    %42 = arith.mulf %41, %41 : vector<8x128xf32>
    %cst_28 = arith.constant dense<0.000000e+00> : vector<8xf32>
    %43 = vector.multi_reduction <add>, %42, %cst_28 [1] : vector<8x128xf32> to vector<8xf32>
    %44 = vector.shape_cast %43 : vector<8xf32> to vector<8x1xf32>
    %cst_29 = arith.constant 3.125000e-02 : f32
    %45 = vector.broadcast %cst_29 : f32 to vector<8x1xf32>
    %46 = arith.mulf %44, %45 : vector<8x1xf32>
    %cst_30 = arith.constant 9.99999974E-6 : f32
    %47 = vector.broadcast %cst_30 : f32 to vector<8x1xf32>
    %48 = arith.addf %46, %47 : vector<8x1xf32>
    %49 = math.rsqrt %48 : vector<8x1xf32>
    %50 = vector.broadcast %49 : vector<8x1xf32> to vector<8x128xf32>
    %51 = arith.mulf %41, %50 : vector<8x128xf32>
    %c0_31 = arith.constant 0 : index
    %c0_32 = arith.constant 0 : index
    %52 = vector.load %arg11[%c0_31, %c0_32] : memref<8x128xf32, #tpu.memory_space<vmem>>, vector<8x128xf32>
    tpu.vector_store %arg11[%c0_31, %c0_32], %51 {strides = array<i32>} : memref<8x128xf32, #tpu.memory_space<vmem>>, vector<8x128xf32>,
    return
  }
  func.func @transform_0(%arg0: i32) -> (i32, i32) {
    %c0_i32 = arith.constant 0 : i32
    %c0_i32_0 = arith.constant 0 : i32
    return %arg0, %c0_i32 : i32, i32
  }
  func.func @transform_1(%arg0: i32) -> (i32, i32) {
    %c0_i32 = arith.constant 0 : i32
    %c0_i32_0 = arith.constant 0 : i32
    return %arg0, %c0_i32 : i32, i32
  }
  func.func @transform_2(%arg0: i32) -> (i32, i32) {
    %c0_i32 = arith.constant 0 : i32
    %c0_i32_0 = arith.constant 0 : i32
    %c0_i32_1 = arith.constant 0 : i32
    return %c0_i32, %c0_i32_0 : i32, i32
  }
  func.func @transform_3(%arg0: i32) -> (i32, i32) {
    %c0_i32 = arith.constant 0 : i32
    %c0_i32_0 = arith.constant 0 : i32
    %c0_i32_1 = arith.constant 0 : i32
    return %c0_i32, %c0_i32_0 : i32, i32
  }
  func.func @transform_4(%arg0: i32) -> (i32, i32) {
    %c0_i32 = arith.constant 0 : i32
    %c0_i32_0 = arith.constant 0 : i32
    %c0_i32_1 = arith.constant 0 : i32
    return %c0_i32, %c0_i32_0 : i32, i32
  }
  func.func @transform_5(%arg0: i32) -> (i32, i32) {
    %c0_i32 = arith.constant 0 : i32
    %c0_i32_0 = arith.constant 0 : i32
    %c0_i32_1 = arith.constant 0 : i32
    return %c0_i32, %c0_i32_0 : i32, i32
  }
  func.func @transform_6(%arg0: i32) -> (i32, i32) {
    %c0_i32 = arith.constant 0 : i32
    %c0_i32_0 = arith.constant 0 : i32
    %c0_i32_1 = arith.constant 0 : i32
    return %c0_i32, %c0_i32_0 : i32, i32
  }
  func.func @transform_7(%arg0: i32) -> (i32, i32) {
    %c0_i32 = arith.constant 0 : i32
    %c0_i32_0 = arith.constant 0 : i32
    %c0_i32_1 = arith.constant 0 : i32
    return %c0_i32, %c0_i32_0 : i32, i32
  }
  func.func @transform_8(%arg0: i32) -> (i32, i32) {
    %c0_i32 = arith.constant 0 : i32
    %c0_i32_0 = arith.constant 0 : i32
    %c0_i32_1 = arith.constant 0 : i32
    return %c0_i32, %c0_i32_0 : i32, i32
  }
  func.func @transform_9(%arg0: i32) -> (i32, i32) {
    %c0_i32 = arith.constant 0 : i32
    %c0_i32_0 = arith.constant 0 : i32
    %c0_i32_1 = arith.constant 0 : i32
    return %c0_i32, %c0_i32_0 : i32, i32
  }
  func.func @transform_10(%arg0: i32) -> (i32, i32) {
    %c0_i32 = arith.constant 0 : i32
    %c0_i32_0 = arith.constant 0 : i32
    return %arg0, %c0_i32 : i32, i32
  }
}

</mosaic_0001>

<bundles_post_ra>
// kernel: tpu_custom_call.1
= control target key start
LH: loop header
LB: loop body
LE: loop exit
PB: predicated region body
PF: predicated region fallthrough
CT: control target
= control target key end

     0   :  { %s1758_s0 = inlined_call_operand.hbm [shape: f32[16,128], index: 0, kind: input, shape index: {}]   ;;  %s1759_s1 = inlined_call_operand.hbm [shape: f32[16,128], index: 1, kind: input, shape index: {}]   ;;  %s1760_s2 = inlined_call_operand.hbm [shape: f32[128,128], index: 2, kind: input, shape index: {}]   ;;  %s1761_s3 = inlined_call_operand.vmem [shape: f32[1,128], index: 3, kind: input, shape index: {}]   ;;  %s1762_s4 = inlined_call_operand.hbm [shape: f32[128,256], index: 4, kind: input, shape index: {}]   ;;  %s1763_s5 = inlined_call_operand.vmem [shape: f32[1,256], index: 5, kind: input, shape index: {}]   ;;  %s1764_s6 = inlined_call_operand.hbm [shape: f32[128,128], index: 6, kind: input, shape index: {}]   ;;  %s1765_s7 = inlined_call_operand.hbm [shape: f32[128,128], index: 7, kind: input, shape index: {}]   ;;  %s1766_s8 = inlined_call_operand.hbm [shape: f32[128,128], index: 8, kind: input, shape index: {}]   ;;  %s1767_s9 = inlined_call_operand.hbm [shape: f32[128,128], index: 9, kind: input, shape index: {}]   ;;  %s1768_s10 = inlined_call_operand.hbm [shape: f32[16,128], index: 10, kind: output, shape index: {}]  }
   0x1   :  { %1771 = sst [smem:[#allocation26_spill]] %s1760_s2 }
   0x2   :  { %1772 = sst [smem:[#allocation27_spill]] %s1762_s4 }
   0x3   :  { %1773 = sst [smem:[#allocation28_spill]] %s1764_s6 }
   0x4   :  { %1774 = sst [smem:[#allocation29_spill]] %s1765_s7 }
   0x5   :  { %1775 = sst [smem:[#allocation30_spill]] %s1766_s8 }
   0x6   :  { %1776 = sst [smem:[#allocation31_spill]] %s1767_s9 }
   0x7   :  { %1777 = sst [smem:[#allocation32_spill]] %s1768_s10 }
   0x8   :  { %15 = vsyncpa [#allocation3], 0 }
   0x9   :  { %17 = vsyncpa [#allocation3 + $0x1], 0 }
   0xa   :  { %18 = vsyncpa [#allocation6], 0 }
   0xb   :  { %20 = vsyncpa [#allocation6 + $0x1], 0 }
   0xc   :  { %21 = vsyncpa [#allocation9], 0 }
   0xd   :  { %22 = vsyncpa [#allocation12], 0 }
   0xe   :  { %23 = vsyncpa [#allocation15], 0 }
   0xf   :  { %24 = vsyncpa [#allocation4], 0 }
  0x10   :  { %26 = vsyncpa [#allocation4 + $0x1], 0  ;;  %s1516_s13 = smov 0   ;;  %s1518_s14 = smov 0  }
  0x11   :  { %s1520_s15 = smov 0   ;;  %s1522_s16 = smov 0  }
  0x12 LB: > { %1778 = sst [smem:[#allocation24_spill]] %s1445_s15  ;;  %s1540_s20 = sadd.s32 4294967295, %s1449_s16   ;;  %s1449_s16 = sphi %s1522_s16, %s1799_s16   ;;  %s1445_s15 = sphi %s1520_s15, %s1796_s15   ;;  %s1441_s14 = sphi %s1518_s14, %s1798_s14   ;;  %s1437_s13 = sphi %s1516_s13, %s1797_s13  }
  0x13   : > { %s1779_s2 = sld [smem:[#allocation26_spill]]  ;;  %p978_p0 = scmp.ge.s32.totalorder %s1449_s16, 1 }
  0x14   : > { %p53_p1 = scmp.eq.s32.totalorder %s1540_s20, 0  ;;  %p283_p2 = scmp.lt.s32.totalorder %s1449_s16, 3 }
  0x15   : > { %s1451_s22 = smov [#allocation7]   ;;  %s1781_s4 = sld [smem:[#allocation27_spill]] }
  0x16   : > { %p1545_p3 = pnand %p978_p0, %p283_p2  ;;  %s296_s23 = sshll.u32 %s1451_s22, 4  ;;  %s297_s23 = int_to_ptr.vmem [resolvable:$true] %s296_s23 }
  0x17   : > { %s1452_s28 = smov [#allocation8]   ;;  %s1453_s30 = smov 128  }
  0x18   : > { %p1034_p4 = pneg %p1545_p3  ;;  %s313_s29 = sshll.u32 %s1452_s28, 4  ;;  %s314_s29 = int_to_ptr.vmem [resolvable:$true] %s313_s29 }
  0x19   : > { %s294_s19 = sshll.u32 %s1779_s2, 4  ;;  %s1454_s11 = smov 8   ;;  %s295_s19 = int_to_ptr.hbm [resolvable:$true] %s294_s19 }
  0x1a   : > { %p1557_p6 = pnand %p1034_p4, %p53_p1  ;;  %s1455_s12 = smov 256  }
  0x1b   : > { %s311_s26 = sshll.u32 %s1781_s4, 4  ;;  %s1456_s17 = smov 16   ;;  %s312_s26 = int_to_ptr.hbm [resolvable:$true] %s311_s26 }
  0x1c   : > { %1037 = dma.hbm_to_vmem [thread:$0]  (!%p1557_p6), %s295_s19, 2048, %s297_s23, [#allocation6], %s1453_s30, %s1453_s30, %s1454_s11  }
  0x1d   : > { %1040 = dma.hbm_to_vmem [thread:$0]  (!%p1557_p6), %s312_s26, 4096, %s314_s29, [#allocation9], %s1455_s12, %s1455_s12, %s1456_s17  }
  0x1e   : > { %s1783_s7 = sld [smem:[#allocation29_spill]]  ;;  %s1457_s25 = smov [#allocation11]  }
  0x1f   : > { %s344_s28 = sshll.u32 %s1457_s25, 4  ;;  %s1784_s6 = sld [smem:[#allocation28_spill]]  ;;  %s345_s28 = int_to_ptr.vmem [resolvable:$true] %s344_s28 }
  0x20   : > { %s1458_s19 = smov [#allocation10]   ;;  %s1785_s8 = sld [smem:[#allocation30_spill]] }
  0x21   : > { %s330_s23 = sshll.u32 %s1458_s19, 4  ;;  %s1786_s9 = sld [smem:[#allocation31_spill]]  ;;  %s331_s23 = int_to_ptr.vmem [resolvable:$true] %s330_s23 }
  0x22   : > { %s1459_s18 = smov [#allocation13]   ;;  %s977_s25 = sadd.s32 4294967294, %s1449_s16  }
  0x23   : > { %s358_s22 = sshll.u32 %s1459_s18, 4  ;;  %p46_p8 = scmp.ne.s32.totalorder %s1445_s15, %s1441_s14  ;;  %s359_s22 = int_to_ptr.vmem [resolvable:$true] %s358_s22 }
  0x24   : > { %s342_s24 = sshll.u32 %s1783_s7, 4  ;;  %p47_p9 = scmp.eq.s32.totalorder %s1449_s16, 0  ;;  %s343_s24 = int_to_ptr.hbm [resolvable:$true] %s342_s24 }
  0x25   : > { %s328_s10 = sshll.u32 %s1784_s6, 4  ;;  %p52_p10 = scmp.ne.s32.totalorder %s1441_s14, %s1437_s13  ;;  %s329_s10 = int_to_ptr.hbm [resolvable:$true] %s328_s10 }
  0x26   : > { %1046 = dma.hbm_to_vmem [thread:$0]  (!%p1557_p6), %s343_s24, 2048, %s345_s28, [#allocation12], %s1453_s30, %s1453_s30, %s1454_s11  }
  0x27   : > { %s356_s12 = sshll.u32 %s1785_s8, 4  ;;  %s370_s17 = sshll.u32 %s1786_s9, 4  ;;  %s357_s12 = int_to_ptr.hbm [resolvable:$true] %s356_s12  ;;  %s371_s17 = int_to_ptr.hbm [resolvable:$true] %s370_s17 }
  0x28   : > { %1043 = dma.hbm_to_vmem [thread:$0]  (!%p1557_p6), %s329_s10, 2048, %s331_s23, [#allocation9], %s1453_s30, %s1453_s30, %s1454_s11  }
  0x29   : > { %1049 = dma.hbm_to_vmem [thread:$0]  (!%p1557_p6), %s357_s12, 2048, %s359_s22, [#allocation12], %s1453_s30, %s1453_s30, %s1454_s11  }
  0x2a   : > { %s1460_s10 = smov [#allocation14]   ;;  %s1602_s28 = sadd.s32 1, %s1449_s16  }
  0x2b   : > { %s372_s24 = sshll.u32 %s1460_s10, 4  ;;  %s36_s19 = ssub.s32 %s1449_s16, %s1602_s28  ;;  %s373_s24 = int_to_ptr.vmem [resolvable:$true] %s372_s24 }
  0x2c   : > { %1052 = dma.hbm_to_vmem [thread:$0]  (!%p1557_p6), %s371_s17, 2048, %s373_s24, [#allocation15], %s1453_s30, %s1453_s30, %s1454_s11  }
  0x2d   : > { %s39_s23 = sadd.s32 1, %s1445_s15  ;;  %p37_p7 = scmp.eq.s32.totalorder %s36_s19, 0 }
  0x2e   : > { %p1615_p11 = por %p47_p9, %p46_p8  ;;  %p1621_p12 = por %p53_p1, %p52_p10 }
  0x2f   : > { %s1613_s26 = scalar_select %p37_p7, %s1445_s15, %s39_s23  }
  0x30   : > { %p270_p13 = scmp.eq.s32.totalorder %s1540_s20, 1  ;;  %p276_p0 = scmp.eq.s32.totalorder %s977_s25, 1 }
  0x31   : > { %1787 = sst [smem:[#allocation25_spill]] %s1613_s26  ;;  %p1070_p2 = scmp.lt.s32.totalorder %s1449_s16, 2 }
  0x32   : > { %s386_s11 = sand.u32 1, %s1445_s15   ;;  %p1628_p4 = por %p270_p13, %p46_p8 }
  0x33   : > { %p1632_p6 = por %p276_p0, %p52_p10  ;;  %s1636_s2 = sshll.u32 %s386_s11, 3 }
  0x34   : > { %s987_s4 = sshll.u32 %s1449_s16, 3  ;;  %s390_s10 = scalar_lea.vmem [#allocation2], %s1636_s2 }
  0x35   : > { %s394_s22 = scalar_lea.hbm %s1758_s0, %s987_s4  ;;  %s398_s24 = sshll.u32 %s390_s10, 4  ;;  %s399_s24 = int_to_ptr.vmem [resolvable:$true] %s398_s24 }
  0x36   : > { %s396_s25 = sshll.u32 %s394_s22, 4  ;;  %p1645_p7 = pnand %p1070_p2, %p1615_p11  ;;  %s397_s25 = int_to_ptr.hbm [resolvable:$true] %s396_s25 }
  0x37   : > { %s413_s7 = scalar_lea.hbm %s1759_s1, %s987_s4  ;;  %s405_s8 = sand.u32 1, %s1449_s16  }
  0x38   : > { %s387_s9 = scalar_lea.sflag [#allocation3], %s386_s11  ;;  %s1303_s17 = sshra.s32 %s397_s25, 4  ;;  %s1304_s17 = int_to_ptr.hbm [resolvable:$true] %s1303_s17 }
  0x39   : > { %s1305_s18 = scalar_lea.hbm %s1304_s17, 8  ;;  %p1307_p9 = pneg %p1645_p7 }
  0x3a   : > { %p1306_p8 = scmp.ne.s32.totalorder %s1304_s17, %s1305_s18  ;;  %s1310_s10 = scalar_lea.hbm %s1758_s0, 16 }
  0x3b   : > { %p1311_p13 = scmp.lt.s32.totalorder %s1304_s17, %s1758_s0  ;;  %p1312_p0 = scmp.lt.s32.totalorder %s1310_s10, %s1305_s18 }
  0x3c   : > { %p1308_p10 = pnand %p1307_p9, %p1306_p8 }
  0x3d   : > { %p1313_p2 = por %p1312_p0, %p1311_p13 }
  0x3e   : > { %p1309_p11 = pneg %p1308_p10 }
  0x40   : > { %p1314_p5 = pnand %p1313_p2, %p1309_p11 }
  0x42   : > { %1317 = shalt.err (!%p1314_p5)
}
  0x43   : > { %1056 = dma.hbm_to_vmem [thread:$0]  (!%p1645_p7), %s397_s25, 128, %s399_s24, %s387_s9  }
  0x44   : > { %s415_s11 = sshll.u32 %s413_s7, 4  ;;  %s409_s4 = scalar_lea.vmem [#allocation5], %s1636_s2  ;;  %s416_s11 = int_to_ptr.hbm [resolvable:$true] %s415_s11 }
  0x45   : > { %s417_s26 = sshll.u32 %s409_s4, 4  ;;  %s406_s27 = scalar_lea.sflag [#allocation6], %s405_s8  ;;  %s418_s26 = int_to_ptr.vmem [resolvable:$true] %s417_s26 }
  0x46   : > { %s1333_s22 = sshra.s32 %s416_s11, 4  ;;  %s1340_s10 = scalar_lea.hbm %s1759_s1, 16  ;;  %s1334_s22 = int_to_ptr.hbm [resolvable:$true] %s1333_s22 }
  0x47   : > { %s1335_s15 = scalar_lea.hbm %s1334_s22, 8  ;;  %p1341_p5 = scmp.lt.s32.totalorder %s1334_s22, %s1759_s1 }
  0x48   : > { %p1336_p8 = scmp.ne.s32.totalorder %s1334_s22, %s1335_s15  ;;  %p1342_p13 = scmp.lt.s32.totalorder %s1340_s10, %s1335_s15 }
  0x4a   : > { %p1338_p10 = pnand %p1336_p8, %p1307_p9  ;;  %p1343_p0 = por %p1342_p13, %p1341_p5 }
  0x4c   : > { %p1339_p11 = pneg %p1338_p10 }
  0x4e   : > { %p1344_p2 = pnand %p1343_p0, %p1339_p11 }
  0x50   : > { %1347 = shalt.err (!%p1344_p2)
}
  0x51   : > { %1059 = dma.hbm_to_vmem [thread:$0]  (!%p1645_p7), %s416_s11, 128, %s418_s26, %s406_s27  }
  0x52   : > { %426 = sbr.rel (%p1545_p3) target bundleno = 1053 (0x41d), region = 60  ;;  %s1681_s7 = sand.u32 (!%p1545_p3), 1, %s1441_s14  }
  0x53   : > { %s1684_s8 = sshll.u32 (!%p1545_p3), %s1681_s7, 3  ;;  %s429_s2 = scalar_lea.sflag (!%p1545_p3), [#allocation3], %s1681_s7 }
  0x54   : > { %s432_s15 = scalar_lea.vmem (!%p1545_p3), [#allocation2], %s1684_s8 }
  0x57   : > { %1408 = dma.done.wait (%p1621_p12), %s429_s2, 128  }
  0x58   : > { %1410 = vsyncadd (%p1621_p12), %s429_s2, 4294967168  ;;  %s438_s21 = sand.u32 1, %s1540_s20   ;;  %s442_s24 = scalar_lea.vmem [#allocation5], %s1684_s8 }
  0x59   : > { %s439_s26 = scalar_lea.sflag [#allocation6], %s438_s21 }
  0x5a   : > { %1412 = dma.done.wait (%p1621_p12), %s439_s26, 128  }
  0x5b   : > { %1414 = vsyncadd (%p1621_p12), %s439_s26, 4294967168 }
  0x5c   : > { %1416 = dma.done.wait (%p53_p1), [#allocation6], 2048  }
  0x5d   : > { %1418 = vsyncadd (%p53_p1), [#allocation6], 4294965248 }
  0x5e   : > { %1420 = dma.done.wait (%p53_p1), [#allocation9], 6144  }
  0x5f   : > { %1422 = vsyncadd (%p53_p1), [#allocation9], 4294961152 }
  0x60   : > { %1424 = dma.done.wait (%p53_p1), [#allocation12], 4096  }
  0x61   : > { %1426 = vsyncadd (%p53_p1), [#allocation12], 4294963200 }
  0x62   : > { %1428 = dma.done.wait (%p53_p1), [#allocation15], 2048  }
  0x63   : > { %1430 = vsyncadd (%p53_p1), [#allocation15], 4294965248  ;;  %v532_v0 = vld [vmem:[#allocation7 + $0x78] sm:$0xff]  ;;  %v531_v1 = vld [vmem:[#allocation7 + $0x70] sm:$0xff]  ;;  %s1001_s11 = sshll.u32 %s1540_s20, 3  ;;  %s1793_s22 = sld [smem:[#allocation32_spill]] }
  0x64   : > { %537 = vmatpush.msra.mxu0 %v532_v0  ;;  %v530_v2 = vld [vmem:[#allocation7 + $0x68] sm:$0xff]  ;;  %v529_v3 = vld [vmem:[#allocation7 + $0x60] sm:$0xff]  ;;  %v650_v4 = vld [vmem:[#allocation10 + $0x78] sm:$0xff]  ;;  %s514_s18 = scalar_lea.vmem [#allocation16], %s1684_s8  ;;  %s812_s20 = scalar_lea.sflag [#allocation4], %s1681_s7 }
  0x65   : > { %v528_v5 = vld [vmem:[#allocation7 + $0x58] sm:$0xff]  ;;  %651 = vmatpush.msra.mxu3 %v650_v4  ;;  %v649_v6 = vld [vmem:[#allocation10 + $0x70] sm:$0xff]  ;;  %v648_v8 = vld [vmem:[#allocation10 + $0x68] sm:$0xff]  ;;  %s824_s10 = sshll.u32 %s514_s18, 4  ;;  %s825_s10 = int_to_ptr.vmem [resolvable:$true] %s824_s10 }
  0x66   : > { %538 = vmatpush.msra.mxu0 %v531_v1  ;;  %v587_v7 = vld [vmem:[#allocation8 + $0xf0] sm:$0xff]  ;;  %v585_v9 = vld [vmem:[#allocation8 + $0xe0] sm:$0xff]  ;;  %v526_v13 = vld [vmem:[#allocation7 + $0x48] sm:$0xff] }
  0x67   : > { %595 = vmatpush.msra.mxu1 %v587_v7  ;;  %v527_v10 = vld [vmem:[#allocation7 + $0x50] sm:$0xff]  ;;  %652 = vmatpush.msra.mxu3 %v649_v6  ;;  %v647_v12 = vld [vmem:[#allocation10 + $0x60] sm:$0xff]  ;;  %v646_v15 = vld [vmem:[#allocation10 + $0x58] sm:$0xff] }
  0x68   : > { %539 = vmatpush.msra.mxu0 %v530_v2  ;;  %v583_v11 = vld [vmem:[#allocation8 + $0xd0] sm:$0xff]  ;;  %v581_v14 = vld [vmem:[#allocation8 + $0xc0] sm:$0xff]  ;;  %v524_v19 = vld [vmem:[#allocation7 + $0x38] sm:$0xff] }
  0x69   : > { %596 = vmatpush.msra.mxu1 %v585_v9  ;;  %653 = vmatpush.msra.mxu3 %v648_v8  ;;  %v525_v16 = vld [vmem:[#allocation7 + $0x40] sm:$0xff]  ;;  %v579_v17 = vld [vmem:[#allocation8 + $0xb0] sm:$0xff]  ;;  %v644_v21 = vld [vmem:[#allocation10 + $0x48] sm:$0xff]  ;;  %s822_s17 = scalar_lea.hbm %s1793_s22, %s1001_s11  ;;  %s1383_s8 = scalar_lea.hbm %s1793_s22, 16 }
  0x6a   : > { %540 = vmatpush.msra.mxu0 %v529_v3  ;;  %v645_v18 = vld [vmem:[#allocation10 + $0x50] sm:$0xff]  ;;  %v577_v20 = vld [vmem:[#allocation8 + $0xa0] sm:$0xff]  ;;  %v522_v25 = vld [vmem:[#allocation7 + $0x28] sm:$0xff]  ;;  %s826_s6 = sshll.u32 %s822_s17, 4  ;;  %s827_s6 = int_to_ptr.hbm [resolvable:$true] %s826_s6 }
  0x6b   : > { %597 = vmatpush.msra.mxu1 %v583_v11  ;;  %654 = vmatpush.msra.mxu3 %v647_v12  ;;  %v523_v22 = vld [vmem:[#allocation7 + $0x30] sm:$0xff]  ;;  %v643_v24 = vld [vmem:[#allocation10 + $0x40] sm:$0xff]  ;;  %v642_v27 = vld [vmem:[#allocation10 + $0x38] sm:$0xff]  ;;  %s1377_s9 = sshra.s32 %s827_s6, 4  ;;  %s1378_s9 = int_to_ptr.hbm [resolvable:$true] %s1377_s9 }
  0x6c   : > { %541 = vmatpush.msra.mxu0 %v528_v5  ;;  %v575_v23 = vld [vmem:[#allocation8 + $0x90] sm:$0xff]  ;;  %v573_v26 = vld [vmem:[#allocation8 + $0x80] sm:$0xff]  ;;  %v520_v31 = vld [vmem:[#allocation7 + $0x18] sm:$0xff]  ;;  %s1379_s2 = scalar_lea.hbm %s1378_s9, 8  ;;  %p1384_p7 = scmp.lt.s32.totalorder %s1378_s9, %s1793_s22 }
  0x6d   : > { %598 = vmatpush.msra.mxu1 %v581_v14  ;;  %655 = vmatpush.msra.mxu3 %v646_v15  ;;  %v521_v28 = vld [vmem:[#allocation7 + $0x20] sm:$0xff]  ;;  %v571_v29 = vld [vmem:[#allocation8 + $0x70] sm:$0xff]  ;;  %v640_v33 = vld [vmem:[#allocation10 + $0x28] sm:$0xff]  ;;  %p1380_p1 = scmp.ne.s32.totalorder %s1378_s9, %s1379_s2  ;;  %p1385_p9 = scmp.lt.s32.totalorder %s1383_s8, %s1379_s2 }
  0x6e   : > { %542 = vmatpush.msra.mxu0 %v527_v10  ;;  %v641_v30 = vld [vmem:[#allocation10 + $0x30] sm:$0xff]  ;;  %v569_v32 = vld [vmem:[#allocation8 + $0x60] sm:$0xff]  ;;  %v518_v37 = vld [vmem:[#allocation7 + $0x8] sm:$0xff] }
  0x6f   : > { %599 = vmatpush.msra.mxu1 %v579_v17  ;;  %656 = vmatpush.msra.mxu3 %v645_v18  ;;  %v519_v34 = vld [vmem:[#allocation7 + $0x10] sm:$0xff]  ;;  %v639_v36 = vld [vmem:[#allocation10 + $0x20] sm:$0xff]  ;;  %v638_v39 = vld [vmem:[#allocation10 + $0x18] sm:$0xff]  ;;  %p1381_p3 = pnand %p1380_p1, %p1628_p4  ;;  %p1386_p8 = por %p1385_p9, %p1384_p7 }
  0x70   : > { %543 = vmatpush.msra.mxu0 %v526_v13  ;;  %v567_v35 = vld [vmem:[#allocation8 + $0x50] sm:$0xff]  ;;  %v565_v38 = vld [vmem:[#allocation8 + $0x40] sm:$0xff]  ;;  %v636_v44 = vld [vmem:[#allocation10 + $0x8] sm:$0xff] }
  0x71   : > { %600 = vmatpush.msra.mxu1 %v577_v20  ;;  %657 = vmatpush.msra.mxu3 %v644_v21  ;;  %v517_v40 = vld [vmem:[#allocation7] sm:$0xff]  ;;  %v516_v41 = vld [vmem:[%s442_s24] sm:$0xff]  ;;  %v586_v51 = vld [vmem:[#allocation8 + $0xe8] sm:$0xff]  ;;  %p1382_p12 = pneg %p1381_p3 }
  0x72   : > { %544 = vmatpush.msra.mxu0 %v525_v16  ;;  %v637_v42 = vld [vmem:[#allocation10 + $0x10] sm:$0xff]  ;;  %v561_v45 = vld [vmem:[#allocation8 + $0x20] sm:$0xff]  ;;  %v588_v50 = vld [vmem:[#allocation8 + $0xf8] sm:$0xff] }
  0x73   : > { %601 = vmatpush.msra.mxu1 %v575_v23  ;;  %658 = vmatpush.msra.mxu3 %v643_v24  ;;  %v563_v43 = vld [vmem:[#allocation8 + $0x30] sm:$0xff]  ;;  %v635_v46 = vld [vmem:[#allocation10] sm:$0xff]  ;;  %v688_v52 = vld [vmem:[#allocation11 + $0x78] sm:$0xff]  ;;  %p1387_p10 = pnand %p1386_p8, %p1382_p12 }
  0x74   : > { %545 = vmatpush.msra.mxu0 %v524_v19  ;;  %v559_v47 = vld [vmem:[#allocation8 + $0x10] sm:$0xff]  ;;  %v557_v48 = vld [vmem:[#allocation8] sm:$0xff]  ;;  %615 = vmatpush.msra.mxu2 %v588_v50  ;;  %v584_v53 = vld [vmem:[#allocation8 + $0xd8] sm:$0xff] }
  0x75   : > { %602 = vmatpush.msra.mxu1 %v573_v26  ;;  %659 = vmatpush.msra.mxu3 %v642_v27  ;;  %v515_v49 = vld [vmem:[%s432_s15] sm:$0xff]  ;;  %v687_v54 = vld [vmem:[#allocation11 + $0x70] sm:$0xff]  ;;  %v580_v58 = vld [vmem:[#allocation8 + $0xb8] sm:$0xff] }
  0x76   : > { %546 = vmatpush.msra.mxu0 %v523_v22  ;;  %616 = vmatpush.msra.mxu2 %v586_v51  ;;  %v686_v55 = vld [vmem:[#allocation11 + $0x68] sm:$0xff]  ;;  %v685_v57 = vld [vmem:[#allocation11 + $0x60] sm:$0xff]  ;;  %v684_v59 = vld [vmem:[#allocation11 + $0x58] sm:$0xff] }
  0x77   : > { %603 = vmatpush.msra.mxu1 %v571_v29  ;;  %660 = vmatpush.msra.mxu3 %v641_v30  ;;  %v582_v56 = vld [vmem:[#allocation8 + $0xc8] sm:$0xff]  ;;  %v683_v61 = vld [vmem:[#allocation11 + $0x50] sm:$0xff]  ;;  %v576_v62 = vld [vmem:[#allocation8 + $0x98] sm:$0xff] }
  0x78   : > { %547 = vmatpush.msra.mxu0 %v522_v25  ;;  %617 = vmatpush.msra.mxu2 %v584_v53  ;;  %v578_v60 = vld [vmem:[#allocation8 + $0xa8] sm:$0xff]  ;;  %v681_v1 = vld [vmem:[#allocation11 + $0x40] sm:$0xff]  ;;  %v572_v2 = vld [vmem:[#allocation8 + $0x78] sm:$0xff] }
  0x79   : > { %604 = vmatpush.msra.mxu1 %v569_v32  ;;  %661 = vmatpush.msra.mxu3 %v640_v33  ;;  %v682_v63 = vld [vmem:[#allocation11 + $0x48] sm:$0xff]  ;;  %v680_v3 = vld [vmem:[#allocation11 + $0x38] sm:$0xff]  ;;  %v679_v5 = vld [vmem:[#allocation11 + $0x30] sm:$0xff] }
  0x7a   : > { %548 = vmatpush.msra.mxu0 %v521_v28  ;;  %618 = vmatpush.msra.mxu2 %v582_v56  ;;  %v574_v0 = vld [vmem:[#allocation8 + $0x88] sm:$0xff]  ;;  %v568_v6 = vld [vmem:[#allocation8 + $0x58] sm:$0xff]  ;;  %v677_v9 = vld [vmem:[#allocation11 + $0x20] sm:$0xff] }
  0x7b   : > { %605 = vmatpush.msra.mxu1 %v567_v35  ;;  %662 = vmatpush.msra.mxu3 %v639_v36  ;;  %v570_v4 = vld [vmem:[#allocation8 + $0x68] sm:$0xff]  ;;  %v564_v10 = vld [vmem:[#allocation8 + $0x38] sm:$0xff]  ;;  %v1120_v12 = vld [vmem:[%s1761_s3] ss:$0 sm:$0xff] }
  0x7c   : > { %549 = vmatpush.msra.mxu0 %v520_v31  ;;  %619 = vmatpush.msra.mxu2 %v580_v58  ;;  %v678_v7 = vld [vmem:[#allocation11 + $0x28] sm:$0xff]  ;;  %v560_v13 = vld [vmem:[#allocation8 + $0x18] sm:$0xff]  ;;  %v675_v18 = vld [vmem:[#allocation11 + $0x10] sm:$0xff] }
  0x7d   : > { %606 = vmatpush.msra.mxu1 %v565_v38  ;;  %663 = vmatpush.msra.mxu3 %v638_v39  ;;  %v566_v8 = vld [vmem:[#allocation8 + $0x48] sm:$0xff]  ;;  %v676_v17 = vld [vmem:[#allocation11 + $0x18] sm:$0xff]  ;;  %v673_v20 = vld [vmem:[#allocation11] sm:$0xff] }
  0x7e   : > { %550 = vmatpush.msra.mxu0 %v519_v34  ;;  %620 = vmatpush.msra.mxu2 %v578_v60  ;;  %v562_v11 = vld [vmem:[#allocation8 + $0x28] sm:$0xff]  ;;  %v726_v21 = vld [vmem:[#allocation13 + $0x78] sm:$0xff]  ;;  %v725_v22 = vld [vmem:[#allocation13 + $0x70] sm:$0xff] }
  0x7f   : > { %664 = vmatpush.msra.mxu3 %v637_v42  ;;  %607 = vmatpush.msra.mxu1 %v563_v43  ;;  %v558_v15 = vld [vmem:[#allocation8 + $0x8] sm:$0xff]  ;;  %v723_v24 = vld [vmem:[#allocation13 + $0x60] sm:$0xff]  ;;  %v722_v25 = vld [vmem:[#allocation13 + $0x58] sm:$0xff] }
  0x80   : > { %551 = vmatpush.msra.mxu0 %v518_v37  ;;  %621 = vmatpush.msra.mxu2 %v576_v62  ;;  %v674_v19 = vld [vmem:[#allocation11 + $0x8] sm:$0xff]  ;;  %v721_v26 = vld [vmem:[#allocation13 + $0x50] sm:$0xff]  ;;  %v719_v28 = vld [vmem:[#allocation13 + $0x40] sm:$0xff] }
  0x81   : > { %665 = vmatpush.msra.mxu3 %v636_v44  ;;  %608 = vmatpush.msra.mxu1 %v561_v45  ;;  %v724_v23 = vld [vmem:[#allocation13 + $0x68] sm:$0xff]  ;;  %v718_v29 = vld [vmem:[#allocation13 + $0x38] sm:$0xff]  ;;  %v717_v30 = vld [vmem:[#allocation13 + $0x30] sm:$0xff] }
  0x82   : > { %552 = vmatpush.msra.mxu0 %v517_v40  ;;  %622 = vmatpush.msra.mxu2 %v574_v0  ;;  %v720_v27 = vld [vmem:[#allocation13 + $0x48] sm:$0xff]  ;;  %v589_v31 = vld [vmem:[%s1763_s5] sm:$0x3]  ;;  %v714_v36 = vld [vmem:[#allocation13 + $0x18] sm:$0xff] }
  0x83   : > { %553 = vmatmul.f32.vlgmr.msra.gmra.mxu0 %v516_v41  ;;  %666 = vmatpush.msra.mxu3 %v635_v46  ;;  %v716_v32 = vld [vmem:[#allocation13 + $0x28] sm:$0xff]  ;;  %v591_v33 = vperm.slane %v589_v31, 0  ;;  %v715_v34 = vld [vmem:[#allocation13 + $0x20] sm:$0xff]  ;;  %v713_v41 = vld [vmem:[#allocation13 + $0x10] sm:$0xff] }
  0x84   : > { %609 = vmatpush.msra.mxu1 %v559_v47  ;;  %689 = vmatpush.msrb.mxu0 %v688_v52  ;;  %v712_v42 = vld [vmem:[#allocation13 + $0x8] sm:$0xff]  ;;  %v711_v43 = vld [vmem:[#allocation13] sm:$0xff]  ;;  %v763_v44 = vld [vmem:[#allocation14 + $0x78] sm:$0xff] }
  0x85   : > { %623 = vmatpush.msra.mxu2 %v572_v2  ;;  %v762_v45 = vld [vmem:[#allocation14 + $0x70] sm:$0xff]  ;;  %v761_v46 = vld [vmem:[#allocation14 + $0x68] sm:$0xff]  ;;  %v760_v47 = vld [vmem:[#allocation14 + $0x60] sm:$0xff] }
  0x86   : > { %610 = vmatpush.msra.mxu1 %v557_v48  ;;  %690 = vmatpush.msrb.mxu0 %v687_v54  ;;  %v759_v48 = vld [vmem:[#allocation14 + $0x58] sm:$0xff]  ;;  %v757_v50 = vld [vmem:[#allocation14 + $0x48] sm:$0xff]  ;;  %v756_v51 = vld [vmem:[#allocation14 + $0x40] sm:$0xff] }
  0x87   : > { %611 = vmatmul.f32.vlgmr.msra.gmra.mxu1 %v515_v49  ;;  %624 = vmatpush.msra.mxu2 %v570_v4  ;;  %v755_v52 = vld [vmem:[#allocation14 + $0x38] sm:$0xff]  ;;  %v754_v53 = vld [vmem:[#allocation14 + $0x30] sm:$0xff]  ;;  %v753_v54 = vld [vmem:[#allocation14 + $0x28] sm:$0xff] }
  0x88   : > { %691 = vmatpush.msrb.mxu0 %v686_v55  ;;  %727 = vmatpush.msrb.mxu1 %v726_v21  ;;  %v592_v55 = vperm.slane %v589_v31, 1  ;;  %v752_v56 = vld [vmem:[#allocation14 + $0x20] sm:$0xff]  ;;  %v751_v58 = vld [vmem:[#allocation14 + $0x18] sm:$0xff]  ;;  %v750_v60 = vld [vmem:[#allocation14 + $0x10] sm:$0xff] }
  0x89   : > { %625 = vmatpush.msra.mxu2 %v568_v6  ;;  %v749_v0 = vld [vmem:[#allocation14 + $0x8] sm:$0xff]  ;;  %v788_v6 = vlaneseq }
  0x8a   : > { %692 = vmatpush.msrb.mxu0 %v685_v57  ;;  %728 = vmatpush.msrb.mxu1 %v725_v22 }
  0x8b   : > { %626 = vmatpush.msra.mxu2 %v566_v8 }
  0x8c   : > { %693 = vmatpush.msrb.mxu0 %v684_v59  ;;  %729 = vmatpush.msrb.mxu1 %v724_v23 }
  0x8d   : > { %627 = vmatpush.msra.mxu2 %v564_v10 }
  0x8e   : > { %694 = vmatpush.msrb.mxu0 %v683_v61  ;;  %730 = vmatpush.msrb.mxu1 %v723_v24 }
  0x8f   : > { %628 = vmatpush.msra.mxu2 %v562_v11 }
  0x90   : > { %695 = vmatpush.msrb.mxu0 %v682_v63  ;;  %731 = vmatpush.msrb.mxu1 %v722_v25 }
  0x91   : > { %629 = vmatpush.msra.mxu2 %v560_v13 }
  0x92   : > { %696 = vmatpush.msrb.mxu0 %v681_v1  ;;  %732 = vmatpush.msrb.mxu1 %v721_v26  ;;  %v748_v1 = vld [vmem:[#allocation14] sm:$0xff] }
  0x93   : > { %630 = vmatpush.msra.mxu2 %v558_v15 }
  0x94   : > { %697 = vmatpush.msrb.mxu0 %v680_v3  ;;  %631 = vmatmul.f32.vlgmr.msra.gmra.mxu2 %v515_v49  ;;  %v758_v49 = vld [vmem:[#allocation14 + $0x50] sm:$0xff] }
  0x95   : > { %733 = vmatpush.msrb.mxu1 %v720_v27  ;;  %764 = vmatpush.msrb.mxu2 %v763_v44 }
  0x96   : > { %698 = vmatpush.msrb.mxu0 %v679_v5 }
  0x97   : > { %734 = vmatpush.msrb.mxu1 %v719_v28  ;;  %765 = vmatpush.msrb.mxu2 %v762_v45 }
  0x98   : > { %699 = vmatpush.msrb.mxu0 %v678_v7  ;;  %v789_v7 = vand.u32 127, %v788_v6 }
  0x99   : > { %735 = vmatpush.msrb.mxu1 %v718_v29  ;;  %766 = vmatpush.msrb.mxu2 %v761_v46 }
  0x9a   : > { %700 = vmatpush.msrb.mxu0 %v677_v9  ;;  %vm790_vm0 = vcmp.lt.s32.totalorder %v789_v7, 32 }
  0x9b   : > { %736 = vmatpush.msrb.mxu1 %v717_v30  ;;  %767 = vmatpush.msrb.mxu2 %v760_v47 }
  0x9c   : > { %701 = vmatpush.msrb.mxu0 %v676_v17 }
  0x9d   : > { %737 = vmatpush.msrb.mxu1 %v716_v32  ;;  %768 = vmatpush.msrb.mxu2 %v759_v48 }
  0x9e   : > { %702 = vmatpush.msrb.mxu0 %v675_v18 }
  0x9f   : > { %738 = vmatpush.msrb.mxu1 %v715_v34  ;;  %769 = vmatpush.msrb.mxu2 %v758_v49 }
  0xa0   : > { %703 = vmatpush.msrb.mxu0 %v674_v19 }
  0xa1   : > { %739 = vmatpush.msrb.mxu1 %v714_v36  ;;  %770 = vmatpush.msrb.mxu2 %v757_v50 }
  0xa2   : > { %704 = vmatpush.msrb.mxu0 %v673_v20 }
  0xa3   : > { %740 = vmatpush.msrb.mxu1 %v713_v41  ;;  %771 = vmatpush.msrb.mxu2 %v756_v51 }
  0xa5   : > { %741 = vmatpush.msrb.mxu1 %v712_v42  ;;  %772 = vmatpush.msrb.mxu2 %v755_v52 }
  0xa7   : > { %742 = vmatpush.msrb.mxu1 %v711_v43  ;;  %773 = vmatpush.msrb.mxu2 %v754_v53 }
  0xa9   : > { %774 = vmatpush.msrb.mxu2 %v753_v54 }
  0xab   : > { %775 = vmatpush.msrb.mxu2 %v752_v56 }
  0xad   : > { %776 = vmatpush.msrb.mxu2 %v751_v58 }
  0xaf   : > { %777 = vmatpush.msrb.mxu2 %v750_v60 }
  0xb1   : > { %778 = vmatpush.msrb.mxu2 %v749_v0 }
  0xb3   : > { %779 = vmatpush.msrb.mxu2 %v748_v1 }
 0x100   : > { %v554_v14 = vpop.f32.mrf.mxu0 }
 0x101   : > { %v555_v16 = vadd.f32 %v1120_v12, %v554_v14 }
 0x103   : > { %667 = vmatmul.f32.vlgmr.msra.gmra.mxu3 %v555_v16 }
 0x104   : > { %v612_v35 = vpop.f32.mrf.mxu1 }
 0x105   : > { %v613_v37 = vadd.f32 %v612_v35, %v591_v33 }
 0x117   : > { %v632_v57 = vpop.f32.mrf.mxu2 }
 0x118   : > { %v633_v59 = vadd.f32 %v632_v57, %v592_v55 }
 0x186   : > { %v668_v38 = vpop.f32.mrf.mxu3 }
 0x187   : > { %v671_v39 = vadd.f32 %v668_v38, %v613_v37 }
 0x189   : > { %v672_v40 = vadd.f32 %v671_v39, %v555_v16 }
 0x18b   : > { %705 = vmatmul.f32.vlgmr.msrb.gmra.mxu0 %v672_v40 }
 0x208   : > { %v706_v61 = vpop.f32.mrf.mxu0 }
 0x209   : > { %v709_v62 = vadd.f32 %v706_v61, %v633_v59 }
 0x20b   : > { %v710_v63 = vadd.f32 %v709_v62, %v672_v40 }
 0x20d   : > { %743 = vmatmul.f32.vlgmr.msrb.gmra.mxu1 %v710_v63 }
 0x28a   : > { %v744_v2 = vpop.f32.mrf.mxu1 }
 0x28b   : > { %v747_v3 = vmax.f32 %v744_v2, 0.0 }
 0x28d   : > { %780 = vmatmul.f32.vlgmr.msrb.gmra.mxu2 %v747_v3 }
 0x310   : > { %v781_v4 = vpop.f32.mrf.mxu2 }
 0x311   : > { %v782_v5 = vadd.f32 %v781_v4, %v710_v63 }
 0x313   : > { %784 = vadd.xlane.f32.xlu0 %v782_v5 }
 0x386   : > { %v785_v8 = vpop.xlane.xlu0 %784 }
 0x387   : > { %v786_v9 = vmul.f32 0.03125, %v785_v8 }
 0x389   : > { %v787_v10 = vsub.f32 %v782_v5, %v786_v9 }
 0x38b   : > { %v793_v11 = vsel %vm790_vm0, %v787_v10, 0.0 }
 0x38c   : > { %v794_v12 = vmul.f32 %v793_v11, %v793_v11 }
 0x38e   : > { %795 = vadd.xlane.f32.xlu0 %v794_v12 }
 0x401   : > { %v796_v13 = vpop.xlane.xlu0 %795 }
 0x402   : > { %v797_v14 = vmul.f32 0.03125, %v796_v13 }
 0x404   : > { %v798_v15 = vadd.f32 1e-05, %v797_v14 }
 0x406   : > { %1121 = vrsqrt.f32 %v798_v15  ;;  %vm805_vm2 = vweird.f32 %v798_v15 }
 0x40c   : > { %v1122_v16 = vpop.eup %1121 }
 0x40d   : > { %v800_v17 = vmul.f32 %v1122_v16, %v798_v15  ;;  %vm806_vm1 = vweird.f32 %v1122_v16 }
 0x40e   : > { %vm807_vm3 = vmor %vm805_vm2, %vm806_vm1 }
 0x40f   : > { %v801_v18 = vmul.f32 %v1122_v16, %v800_v17 }
 0x411   : > { %v802_v19 = vmul.f32 0.5, %v801_v18 }
 0x413   : > { %v803_v20 = vsub.f32 1.5, %v802_v19 }
 0x415   : > { %v804_v21 = vmul.f32 %v1122_v16, %v803_v20 }
 0x417   : > { %v808_v22 = vsel %vm807_vm3, %v1122_v16, %v804_v21 }
 0x418   : > { %v809_v23 = vmul.f32 %v808_v22, %v793_v11 }
 0x41a   : > { %810 = vst [vmem:[%s514_s18] sm:$0xff] %v809_v23 }
 0x41b   : > { %1390 = shalt.err (!%p1387_p10)
}
 0x41c   : > { %1032 = dma.vmem_to_hbm [thread:$0]  (%p1628_p4), %s825_s10, 128, %s827_s6, %s812_s20  }
 0x41d PF: > { %s838_s7 = sand.u32 1, %s1437_s13   ;;  %p1794_p11 = scmp.ge.s32.totalorder %s1449_s16, 2 }
 0x41e   : > { %s839_s30 = scalar_lea.sflag [#allocation4], %s838_s7 }
 0x41f   : > { %p1061_p5 = pnand %p1794_p11, %p1632_p6 }
 0x421   : > { %p1062_p13 = pneg %p1061_p5 }
 0x423   : > { %1432 = dma.done.wait (%p1062_p13), %s839_s30, 128  }
 0x424   : > { %1434 = vsyncadd (%p1062_p13), %s839_s30, 4294967168  ;;  %s1795_s25 = sld [smem:[#allocation24_spill]]  ;;  %p29_p0 = scmp.ge.s32.totalorder %s1602_s28, 4  }
 0x425   : > { %s1796_s15 = sld [smem:[#allocation25_spill]]  ;;  %s1797_s13 = smov %s1441_s14 }
 0x426   : > { %s1799_s16 = smov %s1602_s28  ;;  %31 = sbr.rel (!%p29_p0) target bundleno = 18 (0x12), region = 142 }
 0x42a   : > { %s1798_s14 = smov %s1795_s25 }
 0x42b   :  { %845 = vsyncpa [#allocation3], 1 }
 0x42c   :  { %847 = vsyncpa [#allocation3 + $0x1], 1 }
 0x42d   :  { %848 = vsyncpa [#allocation6], 1 }
 0x42e   :  { %850 = vsyncpa [#allocation6 + $0x1], 1 }
 0x42f   :  { %851 = vsyncpa [#allocation9], 1 }
 0x430   :  { %852 = vsyncpa [#allocation12], 1 }
 0x431   :  { %853 = vsyncpa [#allocation15], 1 }
 0x432   :  { %854 = vsyncpa [#allocation4], 1 }
 0x433   :  { %856 = vsyncpa [#allocation4 + $0x1], 1 }

// kernel: tpu_custom_call.1
= control target key start
LH: loop header
LB: loop body
LE: loop exit
PB: predicated region body
PF: predicated region fallthrough
CT: control target
= control target key end

     0   :  { %s1758_s0 = inlined_call_operand.hbm [shape: f32[16,128], index: 0, kind: input, shape index: {}]   ;;  %s1759_s1 = inlined_call_operand.hbm [shape: f32[16,128], index: 1, kind: input, shape index: {}]   ;;  %s1760_s2 = inlined_call_operand.hbm [shape: f32[128,128], index: 2, kind: input, shape index: {}]   ;;  %s1761_s3 = inlined_call_operand.vmem [shape: f32[1,128], index: 3, kind: input, shape index: {}]   ;;  %s1762_s4 = inlined_call_operand.hbm [shape: f32[128,256], index: 4, kind: input, shape index: {}]   ;;  %s1763_s5 = inlined_call_operand.vmem [shape: f32[1,256], index: 5, kind: input, shape index: {}]   ;;  %s1764_s6 = inlined_call_operand.hbm [shape: f32[128,128], index: 6, kind: input, shape index: {}]   ;;  %s1765_s7 = inlined_call_operand.hbm [shape: f32[128,128], index: 7, kind: input, shape index: {}]   ;;  %s1766_s8 = inlined_call_operand.hbm [shape: f32[128,128], index: 8, kind: input, shape index: {}]   ;;  %s1767_s9 = inlined_call_operand.hbm [shape: f32[128,128], index: 9, kind: input, shape index: {}]   ;;  %s1768_s10 = inlined_call_operand.hbm [shape: f32[16,128], index: 10, kind: output, shape index: {}]  }
   0x1   :  { %1771 = sst [smem:[#allocation26_spill]] %s1760_s2 }
   0x2   :  { %1772 = sst [smem:[#allocation27_spill]] %s1762_s4 }
   0x3   :  { %1773 = sst [smem:[#allocation28_spill]] %s1764_s6 }
   0x4   :  { %1774 = sst [smem:[#allocation29_spill]] %s1765_s7 }
   0x5   :  { %1775 = sst [smem:[#allocation30_spill]] %s1766_s8 }
   0x6   :  { %1776 = sst [smem:[#allocation31_spill]] %s1767_s9 }
   0x7   :  { %1777 = sst [smem:[#allocation32_spill]] %s1768_s10 }
   0x8   :  { %15 = vsyncpa [#allocation3], 0 }
   0x9   :  { %17 = vsyncpa [#allocation3 + $0x1], 0 }
   0xa   :  { %18 = vsyncpa [#allocation6], 0 }
   0xb   :  { %20 = vsyncpa [#allocation6 + $0x1], 0 }
   0xc   :  { %21 = vsyncpa [#allocation9], 0 }
   0xd   :  { %22 = vsyncpa [#allocation12], 0 }
   0xe   :  { %23 = vsyncpa [#allocation15], 0 }
   0xf   :  { %24 = vsyncpa [#allocation4], 0 }
  0x10   :  { %26 = vsyncpa [#allocation4 + $0x1], 0  ;;  %s1516_s13 = smov 0   ;;  %s1518_s14 = smov 0  }
  0x11   :  { %s1520_s15 = smov 0   ;;  %s1522_s16 = smov 0  }
  0x12 LB: > { %1778 = sst [smem:[#allocation24_spill]] %s1445_s15  ;;  %s1540_s20 = sadd.s32 4294967295, %s1449_s16   ;;  %s1449_s16 = sphi %s1522_s16, %s1799_s16   ;;  %s1445_s15 = sphi %s1520_s15, %s1796_s15   ;;  %s1441_s14 = sphi %s1518_s14, %s1798_s14   ;;  %s1437_s13 = sphi %s1516_s13, %s1797_s13  }
  0x13   : > { %s1779_s2 = sld [smem:[#allocation26_spill]]  ;;  %p978_p0 = scmp.ge.s32.totalorder %s1449_s16, 1 }
  0x14   : > { %p53_p1 = scmp.eq.s32.totalorder %s1540_s20, 0  ;;  %p283_p2 = scmp.lt.s32.totalorder %s1449_s16, 3 }
  0x15   : > { %s1451_s22 = smov [#allocation7]   ;;  %s1781_s4 = sld [smem:[#allocation27_spill]] }
  0x16   : > { %p1545_p3 = pnand %p978_p0, %p283_p2  ;;  %s296_s23 = sshll.u32 %s1451_s22, 4  ;;  %s297_s23 = int_to_ptr.vmem [resolvable:$true] %s296_s23 }
  0x17   : > { %s1452_s28 = smov [#allocation8]   ;;  %s1453_s30 = smov 128  }
  0x18   : > { %p1034_p4 = pneg %p1545_p3  ;;  %s313_s29 = sshll.u32 %s1452_s28, 4  ;;  %s314_s29 = int_to_ptr.vmem [resolvable:$true] %s313_s29 }
  0x19   : > { %s294_s19 = sshll.u32 %s1779_s2, 4  ;;  %s1454_s11 = smov 8   ;;  %s295_s19 = int_to_ptr.hbm [resolvable:$true] %s294_s19 }
  0x1a   : > { %p1557_p6 = pnand %p1034_p4, %p53_p1  ;;  %s1455_s12 = smov 256  }
  0x1b   : > { %s311_s26 = sshll.u32 %s1781_s4, 4  ;;  %s1456_s17 = smov 16   ;;  %s312_s26 = int_to_ptr.hbm [resolvable:$true] %s311_s26 }
  0x1c   : > { %1037 = dma.hbm_to_vmem [thread:$0]  (!%p1557_p6), %s295_s19, 2048, %s297_s23, [#allocation6], %s1453_s30, %s1453_s30, %s1454_s11  }
  0x1d   : > { %1040 = dma.hbm_to_vmem [thread:$0]  (!%p1557_p6), %s312_s26, 4096, %s314_s29, [#allocation9], %s1455_s12, %s1455_s12, %s1456_s17  }
  0x1e   : > { %s1783_s7 = sld [smem:[#allocation29_spill]]  ;;  %s1457_s25 = smov [#allocation11]  }
  0x1f   : > { %s344_s28 = sshll.u32 %s1457_s25, 4  ;;  %s1784_s6 = sld [smem:[#allocation28_spill]]  ;;  %s345_s28 = int_to_ptr.vmem [resolvable:$true] %s344_s28 }
  0x20   : > { %s1458_s19 = smov [#allocation10]   ;;  %s1785_s8 = sld [smem:[#allocation30_spill]] }
  0x21   : > { %s330_s23 = sshll.u32 %s1458_s19, 4  ;;  %s1786_s9 = sld [smem:[#allocation31_spill]]  ;;  %s331_s23 = int_to_ptr.vmem [resolvable:$true] %s330_s23 }
  0x22   : > { %s1459_s18 = smov [#allocation13]   ;;  %s977_s25 = sadd.s32 4294967294, %s1449_s16  }
  0x23   : > { %s358_s22 = sshll.u32 %s1459_s18, 4  ;;  %p46_p8 = scmp.ne.s32.totalorder %s1445_s15, %s1441_s14  ;;  %s359_s22 = int_to_ptr.vmem [resolvable:$true] %s358_s22 }
  0x24   : > { %s342_s24 = sshll.u32 %s1783_s7, 4  ;;  %p47_p9 = scmp.eq.s32.totalorder %s1449_s16, 0  ;;  %s343_s24 = int_to_ptr.hbm [resolvable:$true] %s342_s24 }
  0x25   : > { %s328_s10 = sshll.u32 %s1784_s6, 4  ;;  %p52_p10 = scmp.ne.s32.totalorder %s1441_s14, %s1437_s13  ;;  %s329_s10 = int_to_ptr.hbm [resolvable:$true] %s328_s10 }
  0x26   : > { %1046 = dma.hbm_to_vmem [thread:$0]  (!%p1557_p6), %s343_s24, 2048, %s345_s28, [#allocation12], %s1453_s30, %s1453_s30, %s1454_s11  }
  0x27   : > { %s356_s12 = sshll.u32 %s1785_s8, 4  ;;  %s370_s17 = sshll.u32 %s1786_s9, 4  ;;  %s357_s12 = int_to_ptr.hbm [resolvable:$true] %s356_s12  ;;  %s371_s17 = int_to_ptr.hbm [resolvable:$true] %s370_s17 }
  0x28   : > { %1043 = dma.hbm_to_vmem [thread:$0]  (!%p1557_p6), %s329_s10, 2048, %s331_s23, [#allocation9], %s1453_s30, %s1453_s30, %s1454_s11  }
  0x29   : > { %1049 = dma.hbm_to_vmem [thread:$0]  (!%p1557_p6), %s357_s12, 2048, %s359_s22, [#allocation12], %s1453_s30, %s1453_s30, %s1454_s11  }
  0x2a   : > { %s1460_s10 = smov [#allocation14]   ;;  %s1602_s28 = sadd.s32 1, %s1449_s16  }
  0x2b   : > { %s372_s24 = sshll.u32 %s1460_s10, 4  ;;  %s36_s19 = ssub.s32 %s1449_s16, %s1602_s28  ;;  %s373_s24 = int_to_ptr.vmem [resolvable:$true] %s372_s24 }
  0x2c   : > { %1052 = dma.hbm_to_vmem [thread:$0]  (!%p1557_p6), %s371_s17, 2048, %s373_s24, [#allocation15], %s1453_s30, %s1453_s30, %s1454_s11  }
  0x2d   : > { %s39_s23 = sadd.s32 1, %s1445_s15  ;;  %p37_p7 = scmp.eq.s32.totalorder %s36_s19, 0 }
  0x2e   : > { %p1615_p11 = por %p47_p9, %p46_p8  ;;  %p1621_p12 = por %p53_p1, %p52_p10 }
  0x2f   : > { %s1613_s26 = scalar_select %p37_p7, %s1445_s15, %s39_s23  }
  0x30   : > { %p270_p13 = scmp.eq.s32.totalorder %s1540_s20, 1  ;;  %p276_p0 = scmp.eq.s32.totalorder %s977_s25, 1 }
  0x31   : > { %1787 = sst [smem:[#allocation25_spill]] %s1613_s26  ;;  %p1070_p2 = scmp.lt.s32.totalorder %s1449_s16, 2 }
  0x32   : > { %s386_s11 = sand.u32 1, %s1445_s15   ;;  %p1628_p4 = por %p270_p13, %p46_p8 }
  0x33   : > { %p1632_p6 = por %p276_p0, %p52_p10  ;;  %s1636_s2 = sshll.u32 %s386_s11, 3 }
  0x34   : > { %s987_s4 = sshll.u32 %s1449_s16, 3  ;;  %s390_s10 = scalar_lea.vmem [#allocation2], %s1636_s2 }
  0x35   : > { %s394_s22 = scalar_lea.hbm %s1758_s0, %s987_s4  ;;  %s398_s24 = sshll.u32 %s390_s10, 4  ;;  %s399_s24 = int_to_ptr.vmem [resolvable:$true] %s398_s24 }
  0x36   : > { %s396_s25 = sshll.u32 %s394_s22, 4  ;;  %p1645_p7 = pnand %p1070_p2, %p1615_p11  ;;  %s397_s25 = int_to_ptr.hbm [resolvable:$true] %s396_s25 }
  0x37   : > { %s413_s7 = scalar_lea.hbm %s1759_s1, %s987_s4  ;;  %s405_s8 = sand.u32 1, %s1449_s16  }
  0x38   : > { %s387_s9 = scalar_lea.sflag [#allocation3], %s386_s11  ;;  %s1303_s17 = sshra.s32 %s397_s25, 4  ;;  %s1304_s17 = int_to_ptr.hbm [resolvable:$true] %s1303_s17 }
  0x39   : > { %s1305_s18 = scalar_lea.hbm %s1304_s17, 8  ;;  %p1307_p9 = pneg %p1645_p7 }
  0x3a   : > { %p1306_p8 = scmp.ne.s32.totalorder %s1304_s17, %s1305_s18  ;;  %s1310_s10 = scalar_lea.hbm %s1758_s0, 16 }
  0x3b   : > { %p1311_p13 = scmp.lt.s32.totalorder %s1304_s17, %s1758_s0  ;;  %p1312_p0 = scmp.lt.s32.totalorder %s1310_s10, %s1305_s18 }
  0x3c   : > { %p1308_p10 = pnand %p1307_p9, %p1306_p8 }
  0x3d   : > { %p1313_p2 = por %p1312_p0, %p1311_p13 }
  0x3e   : > { %p1309_p11 = pneg %p1308_p10 }
  0x40   : > { %p1314_p5 = pnand %p1313_p2, %p1309_p11 }
  0x42   : > { %1317 = shalt.err (!%p1314_p5)
}
  0x43   : > { %1056 = dma.hbm_to_vmem [thread:$0]  (!%p1645_p7), %s397_s25, 128, %s399_s24, %s387_s9  }
  0x44   : > { %s415_s11 = sshll.u32 %s413_s7, 4  ;;  %s409_s4 = scalar_lea.vmem [#allocation5], %s1636_s2  ;;  %s416_s11 = int_to_ptr.hbm [resolvable:$true] %s415_s11 }
  0x45   : > { %s417_s26 = sshll.u32 %s409_s4, 4  ;;  %s406_s27 = scalar_lea.sflag [#allocation6], %s405_s8  ;;  %s418_s26 = int_to_ptr.vmem [resolvable:$true] %s417_s26 }
  0x46   : > { %s1333_s22 = sshra.s32 %s416_s11, 4  ;;  %s1340_s10 = scalar_lea.hbm %s1759_s1, 16  ;;  %s1334_s22 = int_to_ptr.hbm [resolvable:$true] %s1333_s22 }
  0x47   : > { %s1335_s15 = scalar_lea.hbm %s1334_s22, 8  ;;  %p1341_p5 = scmp.lt.s32.totalorder %s1334_s22, %s1759_s1 }
  0x48   : > { %p1336_p8 = scmp.ne.s32.totalorder %s1334_s22, %s1335_s15  ;;  %p1342_p13 = scmp.lt.s32.totalorder %s1340_s10, %s1335_s15 }
  0x4a   : > { %p1338_p10 = pnand %p1336_p8, %p1307_p9  ;;  %p1343_p0 = por %p1342_p13, %p1341_p5 }
  0x4c   : > { %p1339_p11 = pneg %p1338_p10 }
  0x4e   : > { %p1344_p2 = pnand %p1343_p0, %p1339_p11 }
  0x50   : > { %1347 = shalt.err (!%p1344_p2)
}
  0x51   : > { %1059 = dma.hbm_to_vmem [thread:$0]  (!%p1645_p7), %s416_s11, 128, %s418_s26, %s406_s27  }
  0x52   : > { %426 = sbr.rel (%p1545_p3) target bundleno = 1053 (0x41d), region = 60  ;;  %s1681_s7 = sand.u32 (!%p1545_p3), 1, %s1441_s14  }
  0x53   : > { %s1684_s8 = sshll.u32 (!%p1545_p3), %s1681_s7, 3  ;;  %s429_s2 = scalar_lea.sflag (!%p1545_p3), [#allocation3], %s1681_s7 }
  0x54   : > { %s432_s15 = scalar_lea.vmem (!%p1545_p3), [#allocation2], %s1684_s8 }
  0x57   : > { %1408 = dma.done.wait (%p1621_p12), %s429_s2, 128  }
  0x58   : > { %1410 = vsyncadd (%p1621_p12), %s429_s2, 4294967168  ;;  %s438_s21 = sand.u32 1, %s1540_s20   ;;  %s442_s24 = scalar_lea.vmem [#allocation5], %s1684_s8 }
  0x59   : > { %s439_s26 = scalar_lea.sflag [#allocation6], %s438_s21 }
  0x5a   : > { %1412 = dma.done.wait (%p1621_p12), %s439_s26, 128  }
  0x5b   : > { %1414 = vsyncadd (%p1621_p12), %s439_s26, 4294967168 }
  0x5c   : > { %1416 = dma.done.wait (%p53_p1), [#allocation6], 2048  }
  0x5d   : > { %1418 = vsyncadd (%p53_p1), [#allocation6], 4294965248 }
  0x5e   : > { %1420 = dma.done.wait (%p53_p1), [#allocation9], 6144  }
  0x5f   : > { %1422 = vsyncadd (%p53_p1), [#allocation9], 4294961152 }
  0x60   : > { %1424 = dma.done.wait (%p53_p1), [#allocation12], 4096  }
  0x61   : > { %1426 = vsyncadd (%p53_p1), [#allocation12], 4294963200 }
  0x62   : > { %1428 = dma.done.wait (%p53_p1), [#allocation15], 2048  }
  0x63   : > { %1430 = vsyncadd (%p53_p1), [#allocation15], 4294965248  ;;  %v532_v0 = vld [vmem:[#allocation7 + $0x78] sm:$0xff]  ;;  %v531_v1 = vld [vmem:[#allocation7 + $0x70] sm:$0xff]  ;;  %s1001_s11 = sshll.u32 %s1540_s20, 3  ;;  %s1793_s22 = sld [smem:[#allocation32_spill]] }
  0x64   : > { %537 = vmatpush.msra.mxu0 %v532_v0  ;;  %v530_v2 = vld [vmem:[#allocation7 + $0x68] sm:$0xff]  ;;  %v529_v3 = vld [vmem:[#allocation7 + $0x60] sm:$0xff]  ;;  %v650_v4 = vld [vmem:[#allocation10 + $0x78] sm:$0xff]  ;;  %s514_s18 = scalar_lea.vmem [#allocation16], %s1684_s8  ;;  %s812_s20 = scalar_lea.sflag [#allocation4], %s1681_s7 }
  0x65   : > { %v528_v5 = vld [vmem:[#allocation7 + $0x58] sm:$0xff]  ;;  %651 = vmatpush.msra.mxu3 %v650_v4  ;;  %v649_v6 = vld [vmem:[#allocation10 + $0x70] sm:$0xff]  ;;  %v648_v8 = vld [vmem:[#allocation10 + $0x68] sm:$0xff]  ;;  %s824_s10 = sshll.u32 %s514_s18, 4  ;;  %s825_s10 = int_to_ptr.vmem [resolvable:$true] %s824_s10 }
  0x66   : > { %538 = vmatpush.msra.mxu0 %v531_v1  ;;  %v587_v7 = vld [vmem:[#allocation8 + $0xf0] sm:$0xff]  ;;  %v585_v9 = vld [vmem:[#allocation8 + $0xe0] sm:$0xff]  ;;  %v526_v13 = vld [vmem:[#allocation7 + $0x48] sm:$0xff] }
  0x67   : > { %595 = vmatpush.msra.mxu1 %v587_v7  ;;  %v527_v10 = vld [vmem:[#allocation7 + $0x50] sm:$0xff]  ;;  %652 = vmatpush.msra.mxu3 %v649_v6  ;;  %v647_v12 = vld [vmem:[#allocation10 + $0x60] sm:$0xff]  ;;  %v646_v15 = vld [vmem:[#allocation10 + $0x58] sm:$0xff] }
  0x68   : > { %539 = vmatpush.msra.mxu0 %v530_v2  ;;  %v583_v11 = vld [vmem:[#allocation8 + $0xd0] sm:$0xff]  ;;  %v581_v14 = vld [vmem:[#allocation8 + $0xc0] sm:$0xff]  ;;  %v524_v19 = vld [vmem:[#allocation7 + $0x38] sm:$0xff] }
  0x69   : > { %596 = vmatpush.msra.mxu1 %v585_v9  ;;  %653 = vmatpush.msra.mxu3 %v648_v8  ;;  %v525_v16 = vld [vmem:[#allocation7 + $0x40] sm:$0xff]  ;;  %v579_v17 = vld [vmem:[#allocation8 + $0xb0] sm:$0xff]  ;;  %v644_v21 = vld [vmem:[#allocation10 + $0x48] sm:$0xff]  ;;  %s822_s17 = scalar_lea.hbm %s1793_s22, %s1001_s11  ;;  %s1383_s8 = scalar_lea.hbm %s1793_s22, 16 }
  0x6a   : > { %540 = vmatpush.msra.mxu0 %v529_v3  ;;  %v645_v18 = vld [vmem:[#allocation10 + $0x50] sm:$0xff]  ;;  %v577_v20 = vld [vmem:[#allocation8 + $0xa0] sm:$0xff]  ;;  %v522_v25 = vld [vmem:[#allocation7 + $0x28] sm:$0xff]  ;;  %s826_s6 = sshll.u32 %s822_s17, 4  ;;  %s827_s6 = int_to_ptr.hbm [resolvable:$true] %s826_s6 }
  0x6b   : > { %597 = vmatpush.msra.mxu1 %v583_v11  ;;  %654 = vmatpush.msra.mxu3 %v647_v12  ;;  %v523_v22 = vld [vmem:[#allocation7 + $0x30] sm:$0xff]  ;;  %v643_v24 = vld [vmem:[#allocation10 + $0x40] sm:$0xff]  ;;  %v642_v27 = vld [vmem:[#allocation10 + $0x38] sm:$0xff]  ;;  %s1377_s9 = sshra.s32 %s827_s6, 4  ;;  %s1378_s9 = int_to_ptr.hbm [resolvable:$true] %s1377_s9 }
  0x6c   : > { %541 = vmatpush.msra.mxu0 %v528_v5  ;;  %v575_v23 = vld [vmem:[#allocation8 + $0x90] sm:$0xff]  ;;  %v573_v26 = vld [vmem:[#allocation8 + $0x80] sm:$0xff]  ;;  %v520_v31 = vld [vmem:[#allocation7 + $0x18] sm:$0xff]  ;;  %s1379_s2 = scalar_lea.hbm %s1378_s9, 8  ;;  %p1384_p7 = scmp.lt.s32.totalorder %s1378_s9, %s1793_s22 }
  0x6d   : > { %598 = vmatpush.msra.mxu1 %v581_v14  ;;  %655 = vmatpush.msra.mxu3 %v646_v15  ;;  %v521_v28 = vld [vmem:[#allocation7 + $0x20] sm:$0xff]  ;;  %v571_v29 = vld [vmem:[#allocation8 + $0x70] sm:$0xff]  ;;  %v640_v33 = vld [vmem:[#allocation10 + $0x28] sm:$0xff]  ;;  %p1380_p1 = scmp.ne.s32.totalorder %s1378_s9, %s1379_s2  ;;  %p1385_p9 = scmp.lt.s32.totalorder %s1383_s8, %s1379_s2 }
  0x6e   : > { %542 = vmatpush.msra.mxu0 %v527_v10  ;;  %v641_v30 = vld [vmem:[#allocation10 + $0x30] sm:$0xff]  ;;  %v569_v32 = vld [vmem:[#allocation8 + $0x60] sm:$0xff]  ;;  %v518_v37 = vld [vmem:[#allocation7 + $0x8] sm:$0xff] }
  0x6f   : > { %599 = vmatpush.msra.mxu1 %v579_v17  ;;  %656 = vmatpush.msra.mxu3 %v645_v18  ;;  %v519_v34 = vld [vmem:[#allocation7 + $0x10] sm:$0xff]  ;;  %v639_v36 = vld [vmem:[#allocation10 + $0x20] sm:$0xff]  ;;  %v638_v39 = vld [vmem:[#allocation10 + $0x18] sm:$0xff]  ;;  %p1381_p3 = pnand %p1380_p1, %p1628_p4  ;;  %p1386_p8 = por %p1385_p9, %p1384_p7 }
  0x70   : > { %543 = vmatpush.msra.mxu0 %v526_v13  ;;  %v567_v35 = vld [vmem:[#allocation8 + $0x50] sm:$0xff]  ;;  %v565_v38 = vld [vmem:[#allocation8 + $0x40] sm:$0xff]  ;;  %v636_v44 = vld [vmem:[#allocation10 + $0x8] sm:$0xff] }
  0x71   : > { %600 = vmatpush.msra.mxu1 %v577_v20  ;;  %657 = vmatpush.msra.mxu3 %v644_v21  ;;  %v517_v40 = vld [vmem:[#allocation7] sm:$0xff]  ;;  %v516_v41 = vld [vmem:[%s442_s24] sm:$0xff]  ;;  %v586_v51 = vld [vmem:[#allocation8 + $0xe8] sm:$0xff]  ;;  %p1382_p12 = pneg %p1381_p3 }
  0x72   : > { %544 = vmatpush.msra.mxu0 %v525_v16  ;;  %v637_v42 = vld [vmem:[#allocation10 + $0x10] sm:$0xff]  ;;  %v561_v45 = vld [vmem:[#allocation8 + $0x20] sm:$0xff]  ;;  %v588_v50 = vld [vmem:[#allocation8 + $0xf8] sm:$0xff] }
  0x73   : > { %601 = vmatpush.msra.mxu1 %v575_v23  ;;  %658 = vmatpush.msra.mxu3 %v643_v24  ;;  %v563_v43 = vld [vmem:[#allocation8 + $0x30] sm:$0xff]  ;;  %v635_v46 = vld [vmem:[#allocation10] sm:$0xff]  ;;  %v688_v52 = vld [vmem:[#allocation11 + $0x78] sm:$0xff]  ;;  %p1387_p10 = pnand %p1386_p8, %p1382_p12 }
  0x74   : > { %545 = vmatpush.msra.mxu0 %v524_v19  ;;  %v559_v47 = vld [vmem:[#allocation8 + $0x10] sm:$0xff]  ;;  %v557_v48 = vld [vmem:[#allocation8] sm:$0xff]  ;;  %615 = vmatpush.msra.mxu2 %v588_v50  ;;  %v584_v53 = vld [vmem:[#allocation8 + $0xd8] sm:$0xff] }
  0x75   : > { %602 = vmatpush.msra.mxu1 %v573_v26  ;;  %659 = vmatpush.msra.mxu3 %v642_v27  ;;  %v515_v49 = vld [vmem:[%s432_s15] sm:$0xff]  ;;  %v687_v54 = vld [vmem:[#allocation11 + $0x70] sm:$0xff]  ;;  %v580_v58 = vld [vmem:[#allocation8 + $0xb8] sm:$0xff] }
  0x76   : > { %546 = vmatpush.msra.mxu0 %v523_v22  ;;  %616 = vmatpush.msra.mxu2 %v586_v51  ;;  %v686_v55 = vld [vmem:[#allocation11 + $0x68] sm:$0xff]  ;;  %v685_v57 = vld [vmem:[#allocation11 + $0x60] sm:$0xff]  ;;  %v684_v59 = vld [vmem:[#allocation11 + $0x58] sm:$0xff] }
  0x77   : > { %603 = vmatpush.msra.mxu1 %v571_v29  ;;  %660 = vmatpush.msra.mxu3 %v641_v30  ;;  %v582_v56 = vld [vmem:[#allocation8 + $0xc8] sm:$0xff]  ;;  %v683_v61 = vld [vmem:[#allocation11 + $0x50] sm:$0xff]  ;;  %v576_v62 = vld [vmem:[#allocation8 + $0x98] sm:$0xff] }
  0x78   : > { %547 = vmatpush.msra.mxu0 %v522_v25  ;;  %617 = vmatpush.msra.mxu2 %v584_v53  ;;  %v578_v60 = vld [vmem:[#allocation8 + $0xa8] sm:$0xff]  ;;  %v681_v1 = vld [vmem:[#allocation11 + $0x40] sm:$0xff]  ;;  %v572_v2 = vld [vmem:[#allocation8 + $0x78] sm:$0xff] }
  0x79   : > { %604 = vmatpush.msra.mxu1 %v569_v32  ;;  %661 = vmatpush.msra.mxu3 %v640_v33  ;;  %v682_v63 = vld [vmem:[#allocation11 + $0x48] sm:$0xff]  ;;  %v680_v3 = vld [vmem:[#allocation11 + $0x38] sm:$0xff]  ;;  %v679_v5 = vld [vmem:[#allocation11 + $0x30] sm:$0xff] }
  0x7a   : > { %548 = vmatpush.msra.mxu0 %v521_v28  ;;  %618 = vmatpush.msra.mxu2 %v582_v56  ;;  %v574_v0 = vld [vmem:[#allocation8 + $0x88] sm:$0xff]  ;;  %v568_v6 = vld [vmem:[#allocation8 + $0x58] sm:$0xff]  ;;  %v677_v9 = vld [vmem:[#allocation11 + $0x20] sm:$0xff] }
  0x7b   : > { %605 = vmatpush.msra.mxu1 %v567_v35  ;;  %662 = vmatpush.msra.mxu3 %v639_v36  ;;  %v570_v4 = vld [vmem:[#allocation8 + $0x68] sm:$0xff]  ;;  %v564_v10 = vld [vmem:[#allocation8 + $0x38] sm:$0xff]  ;;  %v1120_v12 = vld [vmem:[%s1761_s3] ss:$0 sm:$0xff] }
  0x7c   : > { %549 = vmatpush.msra.mxu0 %v520_v31  ;;  %619 = vmatpush.msra.mxu2 %v580_v58  ;;  %v678_v7 = vld [vmem:[#allocation11 + $0x28] sm:$0xff]  ;;  %v560_v13 = vld [vmem:[#allocation8 + $0x18] sm:$0xff]  ;;  %v675_v18 = vld [vmem:[#allocation11 + $0x10] sm:$0xff] }
  0x7d   : > { %606 = vmatpush.msra.mxu1 %v565_v38  ;;  %663 = vmatpush.msra.mxu3 %v638_v39  ;;  %v566_v8 = vld [vmem:[#allocation8 + $0x48] sm:$0xff]  ;;  %v676_v17 = vld [vmem:[#allocation11 + $0x18] sm:$0xff]  ;;  %v673_v20 = vld [vmem:[#allocation11] sm:$0xff] }
  0x7e   : > { %550 = vmatpush.msra.mxu0 %v519_v34  ;;  %620 = vmatpush.msra.mxu2 %v578_v60  ;;  %v562_v11 = vld [vmem:[#allocation8 + $0x28] sm:$0xff]  ;;  %v726_v21 = vld [vmem:[#allocation13 + $0x78] sm:$0xff]  ;;  %v725_v22 = vld [vmem:[#allocation13 + $0x70] sm:$0xff] }
  0x7f   : > { %664 = vmatpush.msra.mxu3 %v637_v42  ;;  %607 = vmatpush.msra.mxu1 %v563_v43  ;;  %v558_v15 = vld [vmem:[#allocation8 + $0x8] sm:$0xff]  ;;  %v723_v24 = vld [vmem:[#allocation13 + $0x60] sm:$0xff]  ;;  %v722_v25 = vld [vmem:[#allocation13 + $0x58] sm:$0xff] }
  0x80   : > { %551 = vmatpush.msra.mxu0 %v518_v37  ;;  %621 = vmatpush.msra.mxu2 %v576_v62  ;;  %v674_v19 = vld [vmem:[#allocation11 + $0x8] sm:$0xff]  ;;  %v721_v26 = vld [vmem:[#allocation13 + $0x50] sm:$0xff]  ;;  %v719_v28 = vld [vmem:[#allocation13 + $0x40] sm:$0xff] }
  0x81   : > { %665 = vmatpush.msra.mxu3 %v636_v44  ;;  %608 = vmatpush.msra.mxu1 %v561_v45  ;;  %v724_v23 = vld [vmem:[#allocation13 + $0x68] sm:$0xff]  ;;  %v718_v29 = vld [vmem:[#allocation13 + $0x38] sm:$0xff]  ;;  %v717_v30 = vld [vmem:[#allocation13 + $0x30] sm:$0xff] }
  0x82   : > { %552 = vmatpush.msra.mxu0 %v517_v40  ;;  %622 = vmatpush.msra.mxu2 %v574_v0  ;;  %v720_v27 = vld [vmem:[#allocation13 + $0x48] sm:$0xff]  ;;  %v589_v31 = vld [vmem:[%s1763_s5] sm:$0x3]  ;;  %v714_v36 = vld [vmem:[#allocation13 + $0x18] sm:$0xff] }
  0x83   : > { %553 = vmatmul.f32.vlgmr.msra.gmra.mxu0 %v516_v41  ;;  %666 = vmatpush.msra.mxu3 %v635_v46  ;;  %v716_v32 = vld [vmem:[#allocation13 + $0x28] sm:$0xff]  ;;  %v591_v33 = vperm.slane %v589_v31, 0  ;;  %v715_v34 = vld [vmem:[#allocation13 + $0x20] sm:$0xff]  ;;  %v713_v41 = vld [vmem:[#allocation13 + $0x10] sm:$0xff] }
  0x84   : > { %609 = vmatpush.msra.mxu1 %v559_v47  ;;  %689 = vmatpush.msrb.mxu0 %v688_v52  ;;  %v712_v42 = vld [vmem:[#allocation13 + $0x8] sm:$0xff]  ;;  %v711_v43 = vld [vmem:[#allocation13] sm:$0xff]  ;;  %v763_v44 = vld [vmem:[#allocation14 + $0x78] sm:$0xff] }
  0x85   : > { %623 = vmatpush.msra.mxu2 %v572_v2  ;;  %v762_v45 = vld [vmem:[#allocation14 + $0x70] sm:$0xff]  ;;  %v761_v46 = vld [vmem:[#allocation14 + $0x68] sm:$0xff]  ;;  %v760_v47 = vld [vmem:[#allocation14 + $0x60] sm:$0xff] }
  0x86   : > { %610 = vmatpush.msra.mxu1 %v557_v48  ;;  %690 = vmatpush.msrb.mxu0 %v687_v54  ;;  %v759_v48 = vld [vmem:[#allocation14 + $0x58] sm:$0xff]  ;;  %v757_v50 = vld [vmem:[#allocation14 + $0x48] sm:$0xff]  ;;  %v756_v51 = vld [vmem:[#allocation14 + $0x40] sm:$0xff] }
  0x87   : > { %611 = vmatmul.f32.vlgmr.msra.gmra.mxu1 %v515_v49  ;;  %624 = vmatpush.msra.mxu2 %v570_v4  ;;  %v755_v52 = vld [vmem:[#allocation14 + $0x38] sm:$0xff]  ;;  %v754_v53 = vld [vmem:[#allocation14 + $0x30] sm:$0xff]  ;;  %v753_v54 = vld [vmem:[#allocation14 + $0x28] sm:$0xff] }
  0x88   : > { %691 = vmatpush.msrb.mxu0 %v686_v55  ;;  %727 = vmatpush.msrb.mxu1 %v726_v21  ;;  %v592_v55 = vperm.slane %v589_v31, 1  ;;  %v752_v56 = vld [vmem:[#allocation14 + $0x20] sm:$0xff]  ;;  %v751_v58 = vld [vmem:[#allocation14 + $0x18] sm:$0xff]  ;;  %v750_v60 = vld [vmem:[#allocation14 + $0x10] sm:$0xff] }
  0x89   : > { %625 = vmatpush.msra.mxu2 %v568_v6  ;;  %v749_v0 = vld [vmem:[#allocation14 + $0x8] sm:$0xff]  ;;  %v788_v6 = vlaneseq }
  0x8a   : > { %692 = vmatpush.msrb.mxu0 %v685_v57  ;;  %728 = vmatpush.msrb.mxu1 %v725_v22 }
  0x8b   : > { %626 = vmatpush.msra.mxu2 %v566_v8 }
  0x8c   : > { %693 = vmatpush.msrb.mxu0 %v684_v59  ;;  %729 = vmatpush.msrb.mxu1 %v724_v23 }
  0x8d   : > { %627 = vmatpush.msra.mxu2 %v564_v10 }
  0x8e   : > { %694 = vmatpush.msrb.mxu0 %v683_v61  ;;  %730 = vmatpush.msrb.mxu1 %v723_v24 }
  0x8f   : > { %628 = vmatpush.msra.mxu2 %v562_v11 }
  0x90   : > { %695 = vmatpush.msrb.mxu0 %v682_v63  ;;  %731 = vmatpush.msrb.mxu1 %v722_v25 }
  0x91   : > { %629 = vmatpush.msra.mxu2 %v560_v13 }
  0x92   : > { %696 = vmatpush.msrb.mxu0 %v681_v1  ;;  %732 = vmatpush.msrb.mxu1 %v721_v26  ;;  %v748_v1 = vld [vmem:[#allocation14] sm:$0xff] }
  0x93   : > { %630 = vmatpush.msra.mxu2 %v558_v15 }
  0x94   : > { %697 = vmatpush.msrb.mxu0 %v680_v3  ;;  %631 = vmatmul.f32.vlgmr.msra.gmra.mxu2 %v515_v49  ;;  %v758_v49 = vld [vmem:[#allocation14 + $0x50] sm:$0xff] }
  0x95   : > { %733 = vmatpush.msrb.mxu1 %v720_v27  ;;  %764 = vmatpush.msrb.mxu2 %v763_v44 }
  0x96   : > { %698 = vmatpush.msrb.mxu0 %v679_v5 }
  0x97   : > { %734 = vmatpush.msrb.mxu1 %v719_v28  ;;  %765 = vmatpush.msrb.mxu2 %v762_v45 }
  0x98   : > { %699 = vmatpush.msrb.mxu0 %v678_v7  ;;  %v789_v7 = vand.u32 127, %v788_v6 }
  0x99   : > { %735 = vmatpush.msrb.mxu1 %v718_v29  ;;  %766 = vmatpush.msrb.mxu2 %v761_v46 }
  0x9a   : > { %700 = vmatpush.msrb.mxu0 %v677_v9  ;;  %vm790_vm0 = vcmp.lt.s32.totalorder %v789_v7, 32 }
  0x9b   : > { %736 = vmatpush.msrb.mxu1 %v717_v30  ;;  %767 = vmatpush.msrb.mxu2 %v760_v47 }
  0x9c   : > { %701 = vmatpush.msrb.mxu0 %v676_v17 }
  0x9d   : > { %737 = vmatpush.msrb.mxu1 %v716_v32  ;;  %768 = vmatpush.msrb.mxu2 %v759_v48 }
  0x9e   : > { %702 = vmatpush.msrb.mxu0 %v675_v18 }
  0x9f   : > { %738 = vmatpush.msrb.mxu1 %v715_v34  ;;  %769 = vmatpush.msrb.mxu2 %v758_v49 }
  0xa0   : > { %703 = vmatpush.msrb.mxu0 %v674_v19 }
  0xa1   : > { %739 = vmatpush.msrb.mxu1 %v714_v36  ;;  %770 = vmatpush.msrb.mxu2 %v757_v50 }
  0xa2   : > { %704 = vmatpush.msrb.mxu0 %v673_v20 }
  0xa3   : > { %740 = vmatpush.msrb.mxu1 %v713_v41  ;;  %771 = vmatpush.msrb.mxu2 %v756_v51 }
  0xa5   : > { %741 = vmatpush.msrb.mxu1 %v712_v42  ;;  %772 = vmatpush.msrb.mxu2 %v755_v52 }
  0xa7   : > { %742 = vmatpush.msrb.mxu1 %v711_v43  ;;  %773 = vmatpush.msrb.mxu2 %v754_v53 }
  0xa9   : > { %774 = vmatpush.msrb.mxu2 %v753_v54 }
  0xab   : > { %775 = vmatpush.msrb.mxu2 %v752_v56 }
  0xad   : > { %776 = vmatpush.msrb.mxu2 %v751_v58 }
  0xaf   : > { %777 = vmatpush.msrb.mxu2 %v750_v60 }
  0xb1   : > { %778 = vmatpush.msrb.mxu2 %v749_v0 }
  0xb3   : > { %779 = vmatpush.msrb.mxu2 %v748_v1 }
 0x100   : > { %v554_v14 = vpop.f32.mrf.mxu0 }
 0x101   : > { %v555_v16 = vadd.f32 %v1120_v12, %v554_v14 }
 0x103   : > { %667 = vmatmul.f32.vlgmr.msra.gmra.mxu3 %v555_v16 }
 0x104   : > { %v612_v35 = vpop.f32.mrf.mxu1 }
 0x105   : > { %v613_v37 = vadd.f32 %v612_v35, %v591_v33 }
 0x117   : > { %v632_v57 = vpop.f32.mrf.mxu2 }
 0x118   : > { %v633_v59 = vadd.f32 %v632_v57, %v592_v55 }
 0x186   : > { %v668_v38 = vpop.f32.mrf.mxu3 }
 0x187   : > { %v671_v39 = vadd.f32 %v668_v38, %v613_v37 }
 0x189   : > { %v672_v40 = vadd.f32 %v671_v39, %v555_v16 }
 0x18b   : > { %705 = vmatmul.f32.vlgmr.msrb.gmra.mxu0 %v672_v40 }
 0x208   : > { %v706_v61 = vpop.f32.mrf.mxu0 }
 0x209   : > { %v709_v62 = vadd.f32 %v706_v61, %v633_v59 }
 0x20b   : > { %v710_v63 = vadd.f32 %v709_v62, %v672_v40 }
 0x20d   : > { %743 = vmatmul.f32.vlgmr.msrb.gmra.mxu1 %v710_v63 }
 0x28a   : > { %v744_v2 = vpop.f32.mrf.mxu1 }
 0x28b   : > { %v747_v3 = vmax.f32 %v744_v2, 0.0 }
 0x28d   : > { %780 = vmatmul.f32.vlgmr.msrb.gmra.mxu2 %v747_v3 }
 0x310   : > { %v781_v4 = vpop.f32.mrf.mxu2 }
 0x311   : > { %v782_v5 = vadd.f32 %v781_v4, %v710_v63 }
 0x313   : > { %784 = vadd.xlane.f32.xlu0 %v782_v5 }
 0x386   : > { %v785_v8 = vpop.xlane.xlu0 %784 }
 0x387   : > { %v786_v9 = vmul.f32 0.03125, %v785_v8 }
 0x389   : > { %v787_v10 = vsub.f32 %v782_v5, %v786_v9 }
 0x38b   : > { %v793_v11 = vsel %vm790_vm0, %v787_v10, 0.0 }
 0x38c   : > { %v794_v12 = vmul.f32 %v793_v11, %v793_v11 }
 0x38e   : > { %795 = vadd.xlane.f32.xlu0 %v794_v12 }
 0x401   : > { %v796_v13 = vpop.xlane.xlu0 %795 }
 0x402   : > { %v797_v14 = vmul.f32 0.03125, %v796_v13 }
 0x404   : > { %v798_v15 = vadd.f32 1e-05, %v797_v14 }
 0x406   : > { %1121 = vrsqrt.f32 %v798_v15  ;;  %vm805_vm2 = vweird.f32 %v798_v15 }
 0x40c   : > { %v1122_v16 = vpop.eup %1121 }
 0x40d   : > { %v800_v17 = vmul.f32 %v1122_v16, %v798_v15  ;;  %vm806_vm1 = vweird.f32 %v1122_v16 }
 0x40e   : > { %vm807_vm3 = vmor %vm805_vm2, %vm806_vm1 }
 0x40f   : > { %v801_v18 = vmul.f32 %v1122_v16, %v800_v17 }
 0x411   : > { %v802_v19 = vmul.f32 0.5, %v801_v18 }
 0x413   : > { %v803_v20 = vsub.f32 1.5, %v802_v19 }
 0x415   : > { %v804_v21 = vmul.f32 %v1122_v16, %v803_v20 }
 0x417   : > { %v808_v22 = vsel %vm807_vm3, %v1122_v16, %v804_v21 }
 0x418   : > { %v809_v23 = vmul.f32 %v808_v22, %v793_v11 }
 0x41a   : > { %810 = vst [vmem:[%s514_s18] sm:$0xff] %v809_v23 }
 0x41b   : > { %1390 = shalt.err (!%p1387_p10)
}
 0x41c   : > { %1032 = dma.vmem_to_hbm [thread:$0]  (%p1628_p4), %s825_s10, 128, %s827_s6, %s812_s20  }
 0x41d PF: > { %s838_s7 = sand.u32 1, %s1437_s13   ;;  %p1794_p11 = scmp.ge.s32.totalorder %s1449_s16, 2 }
 0x41e   : > { %s839_s30 = scalar_lea.sflag [#allocation4], %s838_s7 }
 0x41f   : > { %p1061_p5 = pnand %p1794_p11, %p1632_p6 }
 0x421   : > { %p1062_p13 = pneg %p1061_p5 }
 0x423   : > { %1432 = dma.done.wait (%p1062_p13), %s839_s30, 128  }
 0x424   : > { %1434 = vsyncadd (%p1062_p13), %s839_s30, 4294967168  ;;  %s1795_s25 = sld [smem:[#allocation24_spill]]  ;;  %p29_p0 = scmp.ge.s32.totalorder %s1602_s28, 4  }
 0x425   : > { %s1796_s15 = sld [smem:[#allocation25_spill]]  ;;  %s1797_s13 = smov %s1441_s14 }
 0x426   : > { %s1799_s16 = smov %s1602_s28  ;;  %31 = sbr.rel (!%p29_p0) target bundleno = 18 (0x12), region = 142 }
 0x42a   : > { %s1798_s14 = smov %s1795_s25 }
 0x42b   :  { %845 = vsyncpa [#allocation3], 1 }
 0x42c   :  { %847 = vsyncpa [#allocation3 + $0x1], 1 }
 0x42d   :  { %848 = vsyncpa [#allocation6], 1 }
 0x42e   :  { %850 = vsyncpa [#allocation6 + $0x1], 1 }
 0x42f   :  { %851 = vsyncpa [#allocation9], 1 }
 0x430   :  { %852 = vsyncpa [#allocation12], 1 }
 0x431   :  { %853 = vsyncpa [#allocation15], 1 }
 0x432   :  { %854 = vsyncpa [#allocation4], 1 }
 0x433   :  { %856 = vsyncpa [#allocation4 + $0x1], 1 }

</bundles_post_ra>
